<compile_context>
chip_gen: v5e
topology: v5e:2x2
jax: 0.10.0
libtpu: 0.0.40
codegen_flags: <defaults>
</compile_context>

<pallas_src>
import functools

import jax
import jax.numpy as jnp
from jax.experimental import pallas as pl
from jax.experimental.pallas import tpu as pltpu


# ------------------------------ Pallas kernel -------------------------------

def _sa_kernel(x_ref, w_ref, o_ref, stats_ref, *, H, W, K, pad, inv_c):
    """Fused SpatialAttention for one batch element.

    x_ref:     (1, C, H, W)  VMEM  input activations
    w_ref:     (2, K*K)      SMEM  conv1 weights (plane 0 = avg, plane 1 = max)
    o_ref:     (1, 1, H, W)  VMEM  sigmoid attention map
    stats_ref: (2, H+2p, W+2p) VMEM scratch: zero-padded [avg, max] maps
    """
    x = x_ref[0]                                      # (C, H, W), f32

    # Channel statistics: reduction over the leading axis -> pure VPU work,
    # results are lane-major (H, W) maps (W in lanes, H in sublanes).
    avg = jnp.sum(x, axis=0) * inv_c                  # (H, W)
    mx = jnp.max(x, axis=0)                           # (H, W)

    # Zero-padded stats planes built in VMEM (this IS the Conv2d padding=3
    # zero padding, so semantics hold for any input sign).
    stats_ref[...] = jnp.zeros_like(stats_ref)
    stats_ref[0, pad:pad + H, pad:pad + W] = avg
    stats_ref[1, pad:pad + H, pad:pad + W] = mx

    # 7x7 conv over the 2 planes: 98 shifted FMAs on (H, W) vregs with scalar
    # weights from SMEM (no MXU -- Cin=2/Cout=1 is a terrible matmul shape).
    acc = jnp.zeros((H, W), jnp.float32)
    for kh in range(K):
        for kw in range(K):
            t = kh * K + kw
            acc = acc + stats_ref[0, kh:kh + H, kw:kw + W] * w_ref[0, t]
            acc = acc + stats_ref[1, kh:kh + H, kw:kw + W] * w_ref[1, t]

    o_ref[0, 0] = jax.nn.sigmoid(acc)                 # EUP


# ------------------------------ wrapper --------------------------------------

def spatial_attention(x_nchw, conv1_weight, *, kernel_size=7):
    """x_nchw: (N, C, H, W); conv1_weight: (1, 2, K, K) (PyTorch OIHW, no bias).

    Returns sigmoid(conv(cat([mean_c(x), max_c(x)], 1))) of shape (N, 1, H, W).
    """
    assert kernel_size in (3, 7), "kernel size must be 3 or 7"
    pad = 3 if kernel_size == 7 else 1
    K = kernel_size

    N, C, H, W = x_nchw.shape
    x = x_nchw.astype(jnp.float32)
    # (1, 2, K, K) -> (2, K*K) scalar table in SMEM (plane 0 = avg, 1 = max).
    w_flat = conv1_weight.reshape(2, K * K).astype(jnp.float32)

    kern = functools.partial(_sa_kernel, H=H, W=W, K=K, pad=pad, inv_c=1.0 / C)
    return pl.pallas_call(
        kern,
        out_shape=jax.ShapeDtypeStruct((N, 1, H, W), jnp.float32),
        grid=(N,),
        in_specs=[
            # Full-image block per batch element; last two block dims equal
            # the full array dims so the (8,128) divisibility rule is met.
            pl.BlockSpec((1, C, H, W), lambda n: (n, 0, 0, 0)),
            pl.BlockSpec(memory_space=pltpu.MemorySpace.SMEM),
        ],
        out_specs=pl.BlockSpec((1, 1, H, W), lambda n: (n, 0, 0, 0)),
        scratch_shapes=[pltpu.VMEM((2, H + 2 * pad, W + 2 * pad), jnp.float32)],
        compiler_params=pltpu.CompilerParams(
            dimension_semantics=("parallel",)),
    )(x, w_flat)


# ------------------------------ reference ------------------------------------

def spatial_attention_ref(x, w):
    """Plain-JAX reference (exact f32 math, same op order family)."""
    N, C, H, W = x.shape
    avg = jnp.mean(x, axis=1)
    mx = jnp.max(x, axis=1)
    s = jnp.stack([avg, mx], axis=1)                              # (N, 2, H, W)
    sp = jnp.pad(s, ((0, 0), (0, 0), (3, 3), (3, 3)))
    out = jnp.zeros((N, H, W), jnp.float32)
    for kh in range(7):
        for kw in range(7):
            out = out + sp[:, 0, kh:kh + H, kw:kw + W] * w[0, 0, kh, kw]
            out = out + sp[:, 1, kh:kh + H, kw:kw + W] * w[0, 1, kh, kw]
    return jax.nn.sigmoid(out)[:, None]                           # (N, 1, H, W)


# ------------------------------ test ------------------------------------------

if __name__ == "__main__":
    key = jax.random.PRNGKey(0)
    kx, kw = jax.random.split(key)

    N, C, H, W = 2, 4, 16, 16
    x = jax.random.normal(kx, (N, C, H, W), jnp.float32)          # NCHW
    conv1_w = 0.1 * jax.random.normal(kw, (1, 2, 7, 7), jnp.float32)  # OIHW

    fwd = jax.jit(functools.partial(spatial_attention, kernel_size=7))
    out = jax.block_until_ready(fwd(x, conv1_w))

    assert out.shape == (N, 1, H, W)
    assert bool(jnp.all(jnp.isfinite(out)))

    ref = spatial_attention_ref(x, conv1_w)
    assert bool(jnp.allclose(out, ref, atol=1e-5, rtol=1e-5))

    print("KERNEL_OK")
</pallas_src>

<mosaic_0001>
module attributes {stable_mosaic.version = 11 : i64} {
  func.func @_sa_kernel(%arg0: i32, %arg1: memref<1x4x16x16xf32, #tpu.memory_space<vmem>>, %arg2: memref<2x49xf32, #tpu.memory_space<smem>>, %arg3: memref<1x1x16x16xf32, #tpu.memory_space<vmem>>, %arg4: memref<2x22x22xf32, #tpu.memory_space<vmem>>) attributes {dimension_semantics = [#tpu.dimension_semantics<parallel>], iteration_bounds = array<i64: 2>, scalar_prefetch = 0 : i64, scratch_operands = 1 : i64, tpu.core_type = #tpu.core_type<tc>, window_params = [{transform_indices = @transform_0, window_bounds = array<i64: 1, 4, 16, 16>}, {transform_indices = @transform_1, window_bounds = array<i64: 2, 49>}, {transform_indices = @transform_2, window_bounds = array<i64: 1, 1, 16, 16>}]} {
    %c0 = arith.constant 0 : index
    %c0_0 = arith.constant 0 : index
    %c0_1 = arith.constant 0 : index
    %c0_2 = arith.constant 0 : index
    %0 = vector.load %arg1[%c0, %c0_0, %c0_1, %c0_2] : memref<1x4x16x16xf32, #tpu.memory_space<vmem>>, vector<1x4x16x16xf32>
    %1 = vector.shape_cast %0 : vector<1x4x16x16xf32> to vector<4x16x16xf32>
    %cst = arith.constant dense<0.000000e+00> : vector<16x16xf32>
    %2 = vector.multi_reduction <add>, %1, %cst [0] : vector<4x16x16xf32> to vector<16x16xf32>
    %cst_3 = arith.constant 2.500000e-01 : f32
    %3 = vector.broadcast %cst_3 : f32 to vector<16x16xf32>
    %4 = arith.mulf %2, %3 : vector<16x16xf32>
    %cst_4 = arith.constant dense<0xFF800000> : vector<16x16xf32>
    %5 = vector.multi_reduction <maximumf>, %1, %cst_4 [0] : vector<4x16x16xf32> to vector<16x16xf32>
    %cst_5 = arith.constant 0.000000e+00 : f32
    %6 = vector.broadcast %cst_5 : f32 to vector<2x22x22xf32>
    %c0_6 = arith.constant 0 : index
    %c0_7 = arith.constant 0 : index
    %c0_8 = arith.constant 0 : index
    %7 = vector.load %arg4[%c0_6, %c0_7, %c0_8] : memref<2x22x22xf32, #tpu.memory_space<vmem>>, vector<2x22x22xf32>
    tpu.vector_store %arg4[%c0_6, %c0_7, %c0_8], %6 {strides = array<i32>} : memref<2x22x22xf32, #tpu.memory_space<vmem>>, vector<2x22x22xf32>,
    %c0_9 = arith.constant 0 : index
    %c3 = arith.constant 3 : index
    %c3_10 = arith.constant 3 : index
    %8 = vector.load %arg4[%c0_9, %c3, %c3_10] : memref<2x22x22xf32, #tpu.memory_space<vmem>>, vector<1x16x16xf32>
    %9 = vector.shape_cast %8 : vector<1x16x16xf32> to vector<16x16xf32>
    %10 = vector.shape_cast %4 : vector<16x16xf32> to vector<1x16x16xf32>
    tpu.vector_store %arg4[%c0_9, %c3, %c3_10], %10 {strides = array<i32>} : memref<2x22x22xf32, #tpu.memory_space<vmem>>, vector<1x16x16xf32>,
    %c1 = arith.constant 1 : index
    %c3_11 = arith.constant 3 : index
    %c3_12 = arith.constant 3 : index
    %11 = vector.load %arg4[%c1, %c3_11, %c3_12] : memref<2x22x22xf32, #tpu.memory_space<vmem>>, vector<1x16x16xf32>
    %12 = vector.shape_cast %11 : vector<1x16x16xf32> to vector<16x16xf32>
    %13 = vector.shape_cast %5 : vector<16x16xf32> to vector<1x16x16xf32>
    tpu.vector_store %arg4[%c1, %c3_11, %c3_12], %13 {strides = array<i32>} : memref<2x22x22xf32, #tpu.memory_space<vmem>>, vector<1x16x16xf32>,
    %cst_13 = arith.constant 0.000000e+00 : f32
    %14 = vector.broadcast %cst_13 : f32 to vector<16x16xf32>
    %c0_14 = arith.constant 0 : index
    %c0_15 = arith.constant 0 : index
    %c0_16 = arith.constant 0 : index
    %15 = vector.load %arg4[%c0_14, %c0_15, %c0_16] : memref<2x22x22xf32, #tpu.memory_space<vmem>>, vector<1x16x16xf32>
    %16 = vector.shape_cast %15 : vector<1x16x16xf32> to vector<16x16xf32>
    %c0_17 = arith.constant 0 : index
    %c0_18 = arith.constant 0 : index
    %17 = memref.load %arg2[%c0_17, %c0_18] : memref<2x49xf32, #tpu.memory_space<smem>>
    %18 = vector.broadcast %17 : f32 to vector<16x16xf32>
    %19 = arith.mulf %16, %18 : vector<16x16xf32>
    %20 = arith.addf %14, %19 : vector<16x16xf32>
    %c1_19 = arith.constant 1 : index
    %c0_20 = arith.constant 0 : index
    %c0_21 = arith.constant 0 : index
    %21 = vector.load %arg4[%c1_19, %c0_20, %c0_21] : memref<2x22x22xf32, #tpu.memory_space<vmem>>, vector<1x16x16xf32>
    %22 = vector.shape_cast %21 : vector<1x16x16xf32> to vector<16x16xf32>
    %c1_22 = arith.constant 1 : index
    %c0_23 = arith.constant 0 : index
    %23 = memref.load %arg2[%c1_22, %c0_23] : memref<2x49xf32, #tpu.memory_space<smem>>
    %24 = vector.broadcast %23 : f32 to vector<16x16xf32>
    %25 = arith.mulf %22, %24 : vector<16x16xf32>
    %26 = arith.addf %20, %25 : vector<16x16xf32>
    %c0_24 = arith.constant 0 : index
    %c0_25 = arith.constant 0 : index
    %c1_26 = arith.constant 1 : index
    %27 = vector.load %arg4[%c0_24, %c0_25, %c1_26] : memref<2x22x22xf32, #tpu.memory_space<vmem>>, vector<1x16x16xf32>
    %28 = vector.shape_cast %27 : vector<1x16x16xf32> to vector<16x16xf32>
    %c0_27 = arith.constant 0 : index
    %c1_28 = arith.constant 1 : index
    %29 = memref.load %arg2[%c0_27, %c1_28] : memref<2x49xf32, #tpu.memory_space<smem>>
    %30 = vector.broadcast %29 : f32 to vector<16x16xf32>
    %31 = arith.mulf %28, %30 : vector<16x16xf32>
    %32 = arith.addf %26, %31 : vector<16x16xf32>
    %c1_29 = arith.constant 1 : index
    %c0_30 = arith.constant 0 : index
    %c1_31 = arith.constant 1 : index
    %33 = vector.load %arg4[%c1_29, %c0_30, %c1_31] : memref<2x22x22xf32, #tpu.memory_space<vmem>>, vector<1x16x16xf32>
    %34 = vector.shape_cast %33 : vector<1x16x16xf32> to vector<16x16xf32>
    %c1_32 = arith.constant 1 : index
    %c1_33 = arith.constant 1 : index
    %35 = memref.load %arg2[%c1_32, %c1_33] : memref<2x49xf32, #tpu.memory_space<smem>>
    %36 = vector.broadcast %35 : f32 to vector<16x16xf32>
    %37 = arith.mulf %34, %36 : vector<16x16xf32>
    %38 = arith.addf %32, %37 : vector<16x16xf32>
    %c0_34 = arith.constant 0 : index
    %c0_35 = arith.constant 0 : index
    %c2 = arith.constant 2 : index
    %39 = vector.load %arg4[%c0_34, %c0_35, %c2] : memref<2x22x22xf32, #tpu.memory_space<vmem>>, vector<1x16x16xf32>
    %40 = vector.shape_cast %39 : vector<1x16x16xf32> to vector<16x16xf32>
    %c0_36 = arith.constant 0 : index
    %c2_37 = arith.constant 2 : index
    %41 = memref.load %arg2[%c0_36, %c2_37] : memref<2x49xf32, #tpu.memory_space<smem>>
    %42 = vector.broadcast %41 : f32 to vector<16x16xf32>
    %43 = arith.mulf %40, %42 : vector<16x16xf32>
    %44 = arith.addf %38, %43 : vector<16x16xf32>
    %c1_38 = arith.constant 1 : index
    %c0_39 = arith.constant 0 : index
    %c2_40 = arith.constant 2 : index
    %45 = vector.load %arg4[%c1_38, %c0_39, %c2_40] : memref<2x22x22xf32, #tpu.memory_space<vmem>>, vector<1x16x16xf32>
    %46 = vector.shape_cast %45 : vector<1x16x16xf32> to vector<16x16xf32>
    %c1_41 = arith.constant 1 : index
    %c2_42 = arith.constant 2 : index
    %47 = memref.load %arg2[%c1_41, %c2_42] : memref<2x49xf32, #tpu.memory_space<smem>>
    %48 = vector.broadcast %47 : f32 to vector<16x16xf32>
    %49 = arith.mulf %46, %48 : vector<16x16xf32>
    %50 = arith.addf %44, %49 : vector<16x16xf32>
    %c0_43 = arith.constant 0 : index
    %c0_44 = arith.constant 0 : index
    %c3_45 = arith.constant 3 : index
    %51 = vector.load %arg4[%c0_43, %c0_44, %c3_45] : memref<2x22x22xf32, #tpu.memory_space<vmem>>, vector<1x16x16xf32>
    %52 = vector.shape_cast %51 : vector<1x16x16xf32> to vector<16x16xf32>
    %c0_46 = arith.constant 0 : index
    %c3_47 = arith.constant 3 : index
    %53 = memref.load %arg2[%c0_46, %c3_47] : memref<2x49xf32, #tpu.memory_space<smem>>
    %54 = vector.broadcast %53 : f32 to vector<16x16xf32>
    %55 = arith.mulf %52, %54 : vector<16x16xf32>
    %56 = arith.addf %50, %55 : vector<16x16xf32>
    %c1_48 = arith.constant 1 : index
    %c0_49 = arith.constant 0 : index
    %c3_50 = arith.constant 3 : index
    %57 = vector.load %arg4[%c1_48, %c0_49, %c3_50] : memref<2x22x22xf32, #tpu.memory_space<vmem>>, vector<1x16x16xf32>
    %58 = vector.shape_cast %57 : vector<1x16x16xf32> to vector<16x16xf32>
    %c1_51 = arith.constant 1 : index
    %c3_52 = arith.constant 3 : index
    %59 = memref.load %arg2[%c1_51, %c3_52] : memref<2x49xf32, #tpu.memory_space<smem>>
    %60 = vector.broadcast %59 : f32 to vector<16x16xf32>
    %61 = arith.mulf %58, %60 : vector<16x16xf32>
    %62 = arith.addf %56, %61 : vector<16x16xf32>
    %c0_53 = arith.constant 0 : index
    %c0_54 = arith.constant 0 : index
    %c4 = arith.constant 4 : index
    %63 = vector.load %arg4[%c0_53, %c0_54, %c4] : memref<2x22x22xf32, #tpu.memory_space<vmem>>, vector<1x16x16xf32>
    %64 = vector.shape_cast %63 : vector<1x16x16xf32> to vector<16x16xf32>
    %c0_55 = arith.constant 0 : index
    %c4_56 = arith.constant 4 : index
    %65 = memref.load %arg2[%c0_55, %c4_56] : memref<2x49xf32, #tpu.memory_space<smem>>
    %66 = vector.broadcast %65 : f32 to vector<16x16xf32>
    %67 = arith.mulf %64, %66 : vector<16x16xf32>
    %68 = arith.addf %62, %67 : vector<16x16xf32>
    %c1_57 = arith.constant 1 : index
    %c0_58 = arith.constant 0 : index
    %c4_59 = arith.constant 4 : index
    %69 = vector.load %arg4[%c1_57, %c0_58, %c4_59] : memref<2x22x22xf32, #tpu.memory_space<vmem>>, vector<1x16x16xf32>
    %70 = vector.shape_cast %69 : vector<1x16x16xf32> to vector<16x16xf32>
    %c1_60 = arith.constant 1 : index
    %c4_61 = arith.constant 4 : index
    %71 = memref.load %arg2[%c1_60, %c4_61] : memref<2x49xf32, #tpu.memory_space<smem>>
    %72 = vector.broadcast %71 : f32 to vector<16x16xf32>
    %73 = arith.mulf %70, %72 : vector<16x16xf32>
    %74 = arith.addf %68, %73 : vector<16x16xf32>
    %c0_62 = arith.constant 0 : index
    %c0_63 = arith.constant 0 : index
    %c5 = arith.constant 5 : index
    %75 = vector.load %arg4[%c0_62, %c0_63, %c5] : memref<2x22x22xf32, #tpu.memory_space<vmem>>, vector<1x16x16xf32>
    %76 = vector.shape_cast %75 : vector<1x16x16xf32> to vector<16x16xf32>
    %c0_64 = arith.constant 0 : index
    %c5_65 = arith.constant 5 : index
    %77 = memref.load %arg2[%c0_64, %c5_65] : memref<2x49xf32, #tpu.memory_space<smem>>
    %78 = vector.broadcast %77 : f32 to vector<16x16xf32>
    %79 = arith.mulf %76, %78 : vector<16x16xf32>
    %80 = arith.addf %74, %79 : vector<16x16xf32>
    %c1_66 = arith.constant 1 : index
    %c0_67 = arith.constant 0 : index
    %c5_68 = arith.constant 5 : index
    %81 = vector.load %arg4[%c1_66, %c0_67, %c5_68] : memref<2x22x22xf32, #tpu.memory_space<vmem>>, vector<1x16x16xf32>
    %82 = vector.shape_cast %81 : vector<1x16x16xf32> to vector<16x16xf32>
    %c1_69 = arith.constant 1 : index
    %c5_70 = arith.constant 5 : index
    %83 = memref.load %arg2[%c1_69, %c5_70] : memref<2x49xf32, #tpu.memory_space<smem>>
    %84 = vector.broadcast %83 : f32 to vector<16x16xf32>
    %85 = arith.mulf %82, %84 : vector<16x16xf32>
    %86 = arith.addf %80, %85 : vector<16x16xf32>
    %c0_71 = arith.constant 0 : index
    %c0_72 = arith.constant 0 : index
    %c6 = arith.constant 6 : index
    %87 = vector.load %arg4[%c0_71, %c0_72, %c6] : memref<2x22x22xf32, #tpu.memory_space<vmem>>, vector<1x16x16xf32>
    %88 = vector.shape_cast %87 : vector<1x16x16xf32> to vector<16x16xf32>
    %c0_73 = arith.constant 0 : index
    %c6_74 = arith.constant 6 : index
    %89 = memref.load %arg2[%c0_73, %c6_74] : memref<2x49xf32, #tpu.memory_space<smem>>
    %90 = vector.broadcast %89 : f32 to vector<16x16xf32>
    %91 = arith.mulf %88, %90 : vector<16x16xf32>
    %92 = arith.addf %86, %91 : vector<16x16xf32>
    %c1_75 = arith.constant 1 : index
    %c0_76 = arith.constant 0 : index
    %c6_77 = arith.constant 6 : index
    %93 = vector.load %arg4[%c1_75, %c0_76, %c6_77] : memref<2x22x22xf32, #tpu.memory_space<vmem>>, vector<1x16x16xf32>
    %94 = vector.shape_cast %93 : vector<1x16x16xf32> to vector<16x16xf32>
    %c1_78 = arith.constant 1 : index
    %c6_79 = arith.constant 6 : index
    %95 = memref.load %arg2[%c1_78, %c6_79] : memref<2x49xf32, #tpu.memory_space<smem>>
    %96 = vector.broadcast %95 : f32 to vector<16x16xf32>
    %97 = arith.mulf %94, %96 : vector<16x16xf32>
    %98 = arith.addf %92, %97 : vector<16x16xf32>
    %c0_80 = arith.constant 0 : index
    %c1_81 = arith.constant 1 : index
    %c0_82 = arith.constant 0 : index
    %99 = vector.load %arg4[%c0_80, %c1_81, %c0_82] : memref<2x22x22xf32, #tpu.memory_space<vmem>>, vector<1x16x16xf32>
    %100 = vector.shape_cast %99 : vector<1x16x16xf32> to vector<16x16xf32>
    %c0_83 = arith.constant 0 : index
    %c7 = arith.constant 7 : index
    %101 = memref.load %arg2[%c0_83, %c7] : memref<2x49xf32, #tpu.memory_space<smem>>
    %102 = vector.broadcast %101 : f32 to vector<16x16xf32>
    %103 = arith.mulf %100, %102 : vector<16x16xf32>
    %104 = arith.addf %98, %103 : vector<16x16xf32>
    %c1_84 = arith.constant 1 : index
    %c1_85 = arith.constant 1 : index
    %c0_86 = arith.constant 0 : index
    %105 = vector.load %arg4[%c1_84, %c1_85, %c0_86] : memref<2x22x22xf32, #tpu.memory_space<vmem>>, vector<1x16x16xf32>
    %106 = vector.shape_cast %105 : vector<1x16x16xf32> to vector<16x16xf32>
    %c1_87 = arith.constant 1 : index
    %c7_88 = arith.constant 7 : index
    %107 = memref.load %arg2[%c1_87, %c7_88] : memref<2x49xf32, #tpu.memory_space<smem>>
    %108 = vector.broadcast %107 : f32 to vector<16x16xf32>
    %109 = arith.mulf %106, %108 : vector<16x16xf32>
    %110 = arith.addf %104, %109 : vector<16x16xf32>
    %c0_89 = arith.constant 0 : index
    %c1_90 = arith.constant 1 : index
    %c1_91 = arith.constant 1 : index
    %111 = vector.load %arg4[%c0_89, %c1_90, %c1_91] : memref<2x22x22xf32, #tpu.memory_space<vmem>>, vector<1x16x16xf32>
    %112 = vector.shape_cast %111 : vector<1x16x16xf32> to vector<16x16xf32>
    %c0_92 = arith.constant 0 : index
    %c8 = arith.constant 8 : index
    %113 = memref.load %arg2[%c0_92, %c8] : memref<2x49xf32, #tpu.memory_space<smem>>
    %114 = vector.broadcast %113 : f32 to vector<16x16xf32>
    %115 = arith.mulf %112, %114 : vector<16x16xf32>
    %116 = arith.addf %110, %115 : vector<16x16xf32>
    %c1_93 = arith.constant 1 : index
    %c1_94 = arith.constant 1 : index
    %c1_95 = arith.constant 1 : index
    %117 = vector.load %arg4[%c1_93, %c1_94, %c1_95] : memref<2x22x22xf32, #tpu.memory_space<vmem>>, vector<1x16x16xf32>
    %118 = vector.shape_cast %117 : vector<1x16x16xf32> to vector<16x16xf32>
    %c1_96 = arith.constant 1 : index
    %c8_97 = arith.constant 8 : index
    %119 = memref.load %arg2[%c1_96, %c8_97] : memref<2x49xf32, #tpu.memory_space<smem>>
    %120 = vector.broadcast %119 : f32 to vector<16x16xf32>
    %121 = arith.mulf %118, %120 : vector<16x16xf32>
    %122 = arith.addf %116, %121 : vector<16x16xf32>
    %c0_98 = arith.constant 0 : index
    %c1_99 = arith.constant 1 : index
    %c2_100 = arith.constant 2 : index
    %123 = vector.load %arg4[%c0_98, %c1_99, %c2_100] : memref<2x22x22xf32, #tpu.memory_space<vmem>>, vector<1x16x16xf32>
    %124 = vector.shape_cast %123 : vector<1x16x16xf32> to vector<16x16xf32>
    %c0_101 = arith.constant 0 : index
    %c9 = arith.constant 9 : index
    %125 = memref.load %arg2[%c0_101, %c9] : memref<2x49xf32, #tpu.memory_space<smem>>
    %126 = vector.broadcast %125 : f32 to vector<16x16xf32>
    %127 = arith.mulf %124, %126 : vector<16x16xf32>
    %128 = arith.addf %122, %127 : vector<16x16xf32>
    %c1_102 = arith.constant 1 : index
    %c1_103 = arith.constant 1 : index
    %c2_104 = arith.constant 2 : index
    %129 = vector.load %arg4[%c1_102, %c1_103, %c2_104] : memref<2x22x22xf32, #tpu.memory_space<vmem>>, vector<1x16x16xf32>
    %130 = vector.shape_cast %129 : vector<1x16x16xf32> to vector<16x16xf32>
    %c1_105 = arith.constant 1 : index
    %c9_106 = arith.constant 9 : index
    %131 = memref.load %arg2[%c1_105, %c9_106] : memref<2x49xf32, #tpu.memory_space<smem>>
    %132 = vector.broadcast %131 : f32 to vector<16x16xf32>
    %133 = arith.mulf %130, %132 : vector<16x16xf32>
    %134 = arith.addf %128, %133 : vector<16x16xf32>
    %c0_107 = arith.constant 0 : index
    %c1_108 = arith.constant 1 : index
    %c3_109 = arith.constant 3 : index
    %135 = vector.load %arg4[%c0_107, %c1_108, %c3_109] : memref<2x22x22xf32, #tpu.memory_space<vmem>>, vector<1x16x16xf32>
    %136 = vector.shape_cast %135 : vector<1x16x16xf32> to vector<16x16xf32>
    %c0_110 = arith.constant 0 : index
    %c10 = arith.constant 10 : index
    %137 = memref.load %arg2[%c0_110, %c10] : memref<2x49xf32, #tpu.memory_space<smem>>
    %138 = vector.broadcast %137 : f32 to vector<16x16xf32>
    %139 = arith.mulf %136, %138 : vector<16x16xf32>
    %140 = arith.addf %134, %139 : vector<16x16xf32>
    %c1_111 = arith.constant 1 : index
    %c1_112 = arith.constant 1 : index
    %c3_113 = arith.constant 3 : index
    %141 = vector.load %arg4[%c1_111, %c1_112, %c3_113] : memref<2x22x22xf32, #tpu.memory_space<vmem>>, vector<1x16x16xf32>
    %142 = vector.shape_cast %141 : vector<1x16x16xf32> to vector<16x16xf32>
    %c1_114 = arith.constant 1 : index
    %c10_115 = arith.constant 10 : index
    %143 = memref.load %arg2[%c1_114, %c10_115] : memref<2x49xf32, #tpu.memory_space<smem>>
    %144 = vector.broadcast %143 : f32 to vector<16x16xf32>
    %145 = arith.mulf %142, %144 : vector<16x16xf32>
    %146 = arith.addf %140, %145 : vector<16x16xf32>
    %c0_116 = arith.constant 0 : index
    %c1_117 = arith.constant 1 : index
    %c4_118 = arith.constant 4 : index
    %147 = vector.load %arg4[%c0_116, %c1_117, %c4_118] : memref<2x22x22xf32, #tpu.memory_space<vmem>>, vector<1x16x16xf32>
    %148 = vector.shape_cast %147 : vector<1x16x16xf32> to vector<16x16xf32>
    %c0_119 = arith.constant 0 : index
    %c11 = arith.constant 11 : index
    %149 = memref.load %arg2[%c0_119, %c11] : memref<2x49xf32, #tpu.memory_space<smem>>
    %150 = vector.broadcast %149 : f32 to vector<16x16xf32>
    %151 = arith.mulf %148, %150 : vector<16x16xf32>
    %152 = arith.addf %146, %151 : vector<16x16xf32>
    %c1_120 = arith.constant 1 : index
    %c1_121 = arith.constant 1 : index
    %c4_122 = arith.constant 4 : index
    %153 = vector.load %arg4[%c1_120, %c1_121, %c4_122] : memref<2x22x22xf32, #tpu.memory_space<vmem>>, vector<1x16x16xf32>
    %154 = vector.shape_cast %153 : vector<1x16x16xf32> to vector<16x16xf32>
    %c1_123 = arith.constant 1 : index
    %c11_124 = arith.constant 11 : index
    %155 = memref.load %arg2[%c1_123, %c11_124] : memref<2x49xf32, #tpu.memory_space<smem>>
    %156 = vector.broadcast %155 : f32 to vector<16x16xf32>
    %157 = arith.mulf %154, %156 : vector<16x16xf32>
    %158 = arith.addf %152, %157 : vector<16x16xf32>
    %c0_125 = arith.constant 0 : index
    %c1_126 = arith.constant 1 : index
    %c5_127 = arith.constant 5 : index
    %159 = vector.load %arg4[%c0_125, %c1_126, %c5_127] : memref<2x22x22xf32, #tpu.memory_space<vmem>>, vector<1x16x16xf32>
    %160 = vector.shape_cast %159 : vector<1x16x16xf32> to vector<16x16xf32>
    %c0_128 = arith.constant 0 : index
    %c12 = arith.constant 12 : index
    %161 = memref.load %arg2[%c0_128, %c12] : memref<2x49xf32, #tpu.memory_space<smem>>
    %162 = vector.broadcast %161 : f32 to vector<16x16xf32>
    %163 = arith.mulf %160, %162 : vector<16x16xf32>
    %164 = arith.addf %158, %163 : vector<16x16xf32>
    %c1_129 = arith.constant 1 : index
    %c1_130 = arith.constant 1 : index
    %c5_131 = arith.constant 5 : index
    %165 = vector.load %arg4[%c1_129, %c1_130, %c5_131] : memref<2x22x22xf32, #tpu.memory_space<vmem>>, vector<1x16x16xf32>
    %166 = vector.shape_cast %165 : vector<1x16x16xf32> to vector<16x16xf32>
    %c1_132 = arith.constant 1 : index
    %c12_133 = arith.constant 12 : index
    %167 = memref.load %arg2[%c1_132, %c12_133] : memref<2x49xf32, #tpu.memory_space<smem>>
    %168 = vector.broadcast %167 : f32 to vector<16x16xf32>
    %169 = arith.mulf %166, %168 : vector<16x16xf32>
    %170 = arith.addf %164, %169 : vector<16x16xf32>
    %c0_134 = arith.constant 0 : index
    %c1_135 = arith.constant 1 : index
    %c6_136 = arith.constant 6 : index
    %171 = vector.load %arg4[%c0_134, %c1_135, %c6_136] : memref<2x22x22xf32, #tpu.memory_space<vmem>>, vector<1x16x16xf32>
    %172 = vector.shape_cast %171 : vector<1x16x16xf32> to vector<16x16xf32>
    %c0_137 = arith.constant 0 : index
    %c13 = arith.constant 13 : index
    %173 = memref.load %arg2[%c0_137, %c13] : memref<2x49xf32, #tpu.memory_space<smem>>
    %174 = vector.broadcast %173 : f32 to vector<16x16xf32>
    %175 = arith.mulf %172, %174 : vector<16x16xf32>
    %176 = arith.addf %170, %175 : vector<16x16xf32>
    %c1_138 = arith.constant 1 : index
    %c1_139 = arith.constant 1 : index
    %c6_140 = arith.constant 6 : index
    %177 = vector.load %arg4[%c1_138, %c1_139, %c6_140] : memref<2x22x22xf32, #tpu.memory_space<vmem>>, vector<1x16x16xf32>
    %178 = vector.shape_cast %177 : vector<1x16x16xf32> to vector<16x16xf32>
    %c1_141 = arith.constant 1 : index
    %c13_142 = arith.constant 13 : index
    %179 = memref.load %arg2[%c1_141, %c13_142] : memref<2x49xf32, #tpu.memory_space<smem>>
    %180 = vector.broadcast %179 : f32 to vector<16x16xf32>
    %181 = arith.mulf %178, %180 : vector<16x16xf32>
    %182 = arith.addf %176, %181 : vector<16x16xf32>
    %c0_143 = arith.constant 0 : index
    %c2_144 = arith.constant 2 : index
    %c0_145 = arith.constant 0 : index
    %183 = vector.load %arg4[%c0_143, %c2_144, %c0_145] : memref<2x22x22xf32, #tpu.memory_space<vmem>>, vector<1x16x16xf32>
    %184 = vector.shape_cast %183 : vector<1x16x16xf32> to vector<16x16xf32>
    %c0_146 = arith.constant 0 : index
    %c14 = arith.constant 14 : index
    %185 = memref.load %arg2[%c0_146, %c14] : memref<2x49xf32, #tpu.memory_space<smem>>
    %186 = vector.broadcast %185 : f32 to vector<16x16xf32>
    %187 = arith.mulf %184, %186 : vector<16x16xf32>
    %188 = arith.addf %182, %187 : vector<16x16xf32>
    %c1_147 = arith.constant 1 : index
    %c2_148 = arith.constant 2 : index
    %c0_149 = arith.constant 0 : index
    %189 = vector.load %arg4[%c1_147, %c2_148, %c0_149] : memref<2x22x22xf32, #tpu.memory_space<vmem>>, vector<1x16x16xf32>
    %190 = vector.shape_cast %189 : vector<1x16x16xf32> to vector<16x16xf32>
    %c1_150 = arith.constant 1 : index
    %c14_151 = arith.constant 14 : index
    %191 = memref.load %arg2[%c1_150, %c14_151] : memref<2x49xf32, #tpu.memory_space<smem>>
    %192 = vector.broadcast %191 : f32 to vector<16x16xf32>
    %193 = arith.mulf %190, %192 : vector<16x16xf32>
    %194 = arith.addf %188, %193 : vector<16x16xf32>
    %c0_152 = arith.constant 0 : index
    %c2_153 = arith.constant 2 : index
    %c1_154 = arith.constant 1 : index
    %195 = vector.load %arg4[%c0_152, %c2_153, %c1_154] : memref<2x22x22xf32, #tpu.memory_space<vmem>>, vector<1x16x16xf32>
    %196 = vector.shape_cast %195 : vector<1x16x16xf32> to vector<16x16xf32>
    %c0_155 = arith.constant 0 : index
    %c15 = arith.constant 15 : index
    %197 = memref.load %arg2[%c0_155, %c15] : memref<2x49xf32, #tpu.memory_space<smem>>
    %198 = vector.broadcast %197 : f32 to vector<16x16xf32>
    %199 = arith.mulf %196, %198 : vector<16x16xf32>
    %200 = arith.addf %194, %199 : vector<16x16xf32>
    %c1_156 = arith.constant 1 : index
    %c2_157 = arith.constant 2 : index
    %c1_158 = arith.constant 1 : index
    %201 = vector.load %arg4[%c1_156, %c2_157, %c1_158] : memref<2x22x22xf32, #tpu.memory_space<vmem>>, vector<1x16x16xf32>
    %202 = vector.shape_cast %201 : vector<1x16x16xf32> to vector<16x16xf32>
    %c1_159 = arith.constant 1 : index
    %c15_160 = arith.constant 15 : index
    %203 = memref.load %arg2[%c1_159, %c15_160] : memref<2x49xf32, #tpu.memory_space<smem>>
    %204 = vector.broadcast %203 : f32 to vector<16x16xf32>
    %205 = arith.mulf %202, %204 : vector<16x16xf32>
    %206 = arith.addf %200, %205 : vector<16x16xf32>
    %c0_161 = arith.constant 0 : index
    %c2_162 = arith.constant 2 : index
    %c2_163 = arith.constant 2 : index
    %207 = vector.load %arg4[%c0_161, %c2_162, %c2_163] : memref<2x22x22xf32, #tpu.memory_space<vmem>>, vector<1x16x16xf32>
    %208 = vector.shape_cast %207 : vector<1x16x16xf32> to vector<16x16xf32>
    %c0_164 = arith.constant 0 : index
    %c16 = arith.constant 16 : index
    %209 = memref.load %arg2[%c0_164, %c16] : memref<2x49xf32, #tpu.memory_space<smem>>
    %210 = vector.broadcast %209 : f32 to vector<16x16xf32>
    %211 = arith.mulf %208, %210 : vector<16x16xf32>
    %212 = arith.addf %206, %211 : vector<16x16xf32>
    %c1_165 = arith.constant 1 : index
    %c2_166 = arith.constant 2 : index
    %c2_167 = arith.constant 2 : index
    %213 = vector.load %arg4[%c1_165, %c2_166, %c2_167] : memref<2x22x22xf32, #tpu.memory_space<vmem>>, vector<1x16x16xf32>
    %214 = vector.shape_cast %213 : vector<1x16x16xf32> to vector<16x16xf32>
    %c1_168 = arith.constant 1 : index
    %c16_169 = arith.constant 16 : index
    %215 = memref.load %arg2[%c1_168, %c16_169] : memref<2x49xf32, #tpu.memory_space<smem>>
    %216 = vector.broadcast %215 : f32 to vector<16x16xf32>
    %217 = arith.mulf %214, %216 : vector<16x16xf32>
    %218 = arith.addf %212, %217 : vector<16x16xf32>
    %c0_170 = arith.constant 0 : index
    %c2_171 = arith.constant 2 : index
    %c3_172 = arith.constant 3 : index
    %219 = vector.load %arg4[%c0_170, %c2_171, %c3_172] : memref<2x22x22xf32, #tpu.memory_space<vmem>>, vector<1x16x16xf32>
    %220 = vector.shape_cast %219 : vector<1x16x16xf32> to vector<16x16xf32>
    %c0_173 = arith.constant 0 : index
    %c17 = arith.constant 17 : index
    %221 = memref.load %arg2[%c0_173, %c17] : memref<2x49xf32, #tpu.memory_space<smem>>
    %222 = vector.broadcast %221 : f32 to vector<16x16xf32>
    %223 = arith.mulf %220, %222 : vector<16x16xf32>
    %224 = arith.addf %218, %223 : vector<16x16xf32>
    %c1_174 = arith.constant 1 : index
    %c2_175 = arith.constant 2 : index
    %c3_176 = arith.constant 3 : index
    %225 = vector.load %arg4[%c1_174, %c2_175, %c3_176] : memref<2x22x22xf32, #tpu.memory_space<vmem>>, vector<1x16x16xf32>
    %226 = vector.shape_cast %225 : vector<1x16x16xf32> to vector<16x16xf32>
    %c1_177 = arith.constant 1 : index
    %c17_178 = arith.constant 17 : index
    %227 = memref.load %arg2[%c1_177, %c17_178] : memref<2x49xf32, #tpu.memory_space<smem>>
    %228 = vector.broadcast %227 : f32 to vector<16x16xf32>
    %229 = arith.mulf %226, %228 : vector<16x16xf32>
    %230 = arith.addf %224, %229 : vector<16x16xf32>
    %c0_179 = arith.constant 0 : index
    %c2_180 = arith.constant 2 : index
    %c4_181 = arith.constant 4 : index
    %231 = vector.load %arg4[%c0_179, %c2_180, %c4_181] : memref<2x22x22xf32, #tpu.memory_space<vmem>>, vector<1x16x16xf32>
    %232 = vector.shape_cast %231 : vector<1x16x16xf32> to vector<16x16xf32>
    %c0_182 = arith.constant 0 : index
    %c18 = arith.constant 18 : index
    %233 = memref.load %arg2[%c0_182, %c18] : memref<2x49xf32, #tpu.memory_space<smem>>
    %234 = vector.broadcast %233 : f32 to vector<16x16xf32>
    %235 = arith.mulf %232, %234 : vector<16x16xf32>
    %236 = arith.addf %230, %235 : vector<16x16xf32>
    %c1_183 = arith.constant 1 : index
    %c2_184 = arith.constant 2 : index
    %c4_185 = arith.constant 4 : index
    %237 = vector.load %arg4[%c1_183, %c2_184, %c4_185] : memref<2x22x22xf32, #tpu.memory_space<vmem>>, vector<1x16x16xf32>
    %238 = vector.shape_cast %237 : vector<1x16x16xf32> to vector<16x16xf32>
    %c1_186 = arith.constant 1 : index
    %c18_187 = arith.constant 18 : index
    %239 = memref.load %arg2[%c1_186, %c18_187] : memref<2x49xf32, #tpu.memory_space<smem>>
    %240 = vector.broadcast %239 : f32 to vector<16x16xf32>
    %241 = arith.mulf %238, %240 : vector<16x16xf32>
    %242 = arith.addf %236, %241 : vector<16x16xf32>
    %c0_188 = arith.constant 0 : index
    %c2_189 = arith.constant 2 : index
    %c5_190 = arith.constant 5 : index
    %243 = vector.load %arg4[%c0_188, %c2_189, %c5_190] : memref<2x22x22xf32, #tpu.memory_space<vmem>>, vector<1x16x16xf32>
    %244 = vector.shape_cast %243 : vector<1x16x16xf32> to vector<16x16xf32>
    %c0_191 = arith.constant 0 : index
    %c19 = arith.constant 19 : index
    %245 = memref.load %arg2[%c0_191, %c19] : memref<2x49xf32, #tpu.memory_space<smem>>
    %246 = vector.broadcast %245 : f32 to vector<16x16xf32>
    %247 = arith.mulf %244, %246 : vector<16x16xf32>
    %248 = arith.addf %242, %247 : vector<16x16xf32>
    %c1_192 = arith.constant 1 : index
    %c2_193 = arith.constant 2 : index
    %c5_194 = arith.constant 5 : index
    %249 = vector.load %arg4[%c1_192, %c2_193, %c5_194] : memref<2x22x22xf32, #tpu.memory_space<vmem>>, vector<1x16x16xf32>
    %250 = vector.shape_cast %249 : vector<1x16x16xf32> to vector<16x16xf32>
    %c1_195 = arith.constant 1 : index
    %c19_196 = arith.constant 19 : index
    %251 = memref.load %arg2[%c1_195, %c19_196] : memref<2x49xf32, #tpu.memory_space<smem>>
    %252 = vector.broadcast %251 : f32 to vector<16x16xf32>
    %253 = arith.mulf %250, %252 : vector<16x16xf32>
    %254 = arith.addf %248, %253 : vector<16x16xf32>
    %c0_197 = arith.constant 0 : index
    %c2_198 = arith.constant 2 : index
    %c6_199 = arith.constant 6 : index
    %255 = vector.load %arg4[%c0_197, %c2_198, %c6_199] : memref<2x22x22xf32, #tpu.memory_space<vmem>>, vector<1x16x16xf32>
    %256 = vector.shape_cast %255 : vector<1x16x16xf32> to vector<16x16xf32>
    %c0_200 = arith.constant 0 : index
    %c20 = arith.constant 20 : index
    %257 = memref.load %arg2[%c0_200, %c20] : memref<2x49xf32, #tpu.memory_space<smem>>
    %258 = vector.broadcast %257 : f32 to vector<16x16xf32>
    %259 = arith.mulf %256, %258 : vector<16x16xf32>
    %260 = arith.addf %254, %259 : vector<16x16xf32>
    %c1_201 = arith.constant 1 : index
    %c2_202 = arith.constant 2 : index
    %c6_203 = arith.constant 6 : index
    %261 = vector.load %arg4[%c1_201, %c2_202, %c6_203] : memref<2x22x22xf32, #tpu.memory_space<vmem>>, vector<1x16x16xf32>
    %262 = vector.shape_cast %261 : vector<1x16x16xf32> to vector<16x16xf32>
    %c1_204 = arith.constant 1 : index
    %c20_205 = arith.constant 20 : index
    %263 = memref.load %arg2[%c1_204, %c20_205] : memref<2x49xf32, #tpu.memory_space<smem>>
    %264 = vector.broadcast %263 : f32 to vector<16x16xf32>
    %265 = arith.mulf %262, %264 : vector<16x16xf32>
    %266 = arith.addf %260, %265 : vector<16x16xf32>
    %c0_206 = arith.constant 0 : index
    %c3_207 = arith.constant 3 : index
    %c0_208 = arith.constant 0 : index
    %267 = vector.load %arg4[%c0_206, %c3_207, %c0_208] : memref<2x22x22xf32, #tpu.memory_space<vmem>>, vector<1x16x16xf32>
    %268 = vector.shape_cast %267 : vector<1x16x16xf32> to vector<16x16xf32>
    %c0_209 = arith.constant 0 : index
    %c21 = arith.constant 21 : index
    %269 = memref.load %arg2[%c0_209, %c21] : memref<2x49xf32, #tpu.memory_space<smem>>
    %270 = vector.broadcast %269 : f32 to vector<16x16xf32>
    %271 = arith.mulf %268, %270 : vector<16x16xf32>
    %272 = arith.addf %266, %271 : vector<16x16xf32>
    %c1_210 = arith.constant 1 : index
    %c3_211 = arith.constant 3 : index
    %c0_212 = arith.constant 0 : index
    %273 = vector.load %arg4[%c1_210, %c3_211, %c0_212] : memref<2x22x22xf32, #tpu.memory_space<vmem>>, vector<1x16x16xf32>
    %274 = vector.shape_cast %273 : vector<1x16x16xf32> to vector<16x16xf32>
    %c1_213 = arith.constant 1 : index
    %c21_214 = arith.constant 21 : index
    %275 = memref.load %arg2[%c1_213, %c21_214] : memref<2x49xf32, #tpu.memory_space<smem>>
    %276 = vector.broadcast %275 : f32 to vector<16x16xf32>
    %277 = arith.mulf %274, %276 : vector<16x16xf32>
    %278 = arith.addf %272, %277 : vector<16x16xf32>
    %c0_215 = arith.constant 0 : index
    %c3_216 = arith.constant 3 : index
    %c1_217 = arith.constant 1 : index
    %279 = vector.load %arg4[%c0_215, %c3_216, %c1_217] : memref<2x22x22xf32, #tpu.memory_space<vmem>>, vector<1x16x16xf32>
    %280 = vector.shape_cast %279 : vector<1x16x16xf32> to vector<16x16xf32>
    %c0_218 = arith.constant 0 : index
    %c22 = arith.constant 22 : index
    %281 = memref.load %arg2[%c0_218, %c22] : memref<2x49xf32, #tpu.memory_space<smem>>
    %282 = vector.broadcast %281 : f32 to vector<16x16xf32>
    %283 = arith.mulf %280, %282 : vector<16x16xf32>
    %284 = arith.addf %278, %283 : vector<16x16xf32>
    %c1_219 = arith.constant 1 : index
    %c3_220 = arith.constant 3 : index
    %c1_221 = arith.constant 1 : index
    %285 = vector.load %arg4[%c1_219, %c3_220, %c1_221] : memref<2x22x22xf32, #tpu.memory_space<vmem>>, vector<1x16x16xf32>
    %286 = vector.shape_cast %285 : vector<1x16x16xf32> to vector<16x16xf32>
    %c1_222 = arith.constant 1 : index
    %c22_223 = arith.constant 22 : index
    %287 = memref.load %arg2[%c1_222, %c22_223] : memref<2x49xf32, #tpu.memory_space<smem>>
    %288 = vector.broadcast %287 : f32 to vector<16x16xf32>
    %289 = arith.mulf %286, %288 : vector<16x16xf32>
    %290 = arith.addf %284, %289 : vector<16x16xf32>
    %c0_224 = arith.constant 0 : index
    %c3_225 = arith.constant 3 : index
    %c2_226 = arith.constant 2 : index
    %291 = vector.load %arg4[%c0_224, %c3_225, %c2_226] : memref<2x22x22xf32, #tpu.memory_space<vmem>>, vector<1x16x16xf32>
    %292 = vector.shape_cast %291 : vector<1x16x16xf32> to vector<16x16xf32>
    %c0_227 = arith.constant 0 : index
    %c23 = arith.constant 23 : index
    %293 = memref.load %arg2[%c0_227, %c23] : memref<2x49xf32, #tpu.memory_space<smem>>
    %294 = vector.broadcast %293 : f32 to vector<16x16xf32>
    %295 = arith.mulf %292, %294 : vector<16x16xf32>
    %296 = arith.addf %290, %295 : vector<16x16xf32>
    %c1_228 = arith.constant 1 : index
    %c3_229 = arith.constant 3 : index
    %c2_230 = arith.constant 2 : index
    %297 = vector.load %arg4[%c1_228, %c3_229, %c2_230] : memref<2x22x22xf32, #tpu.memory_space<vmem>>, vector<1x16x16xf32>
    %298 = vector.shape_cast %297 : vector<1x16x16xf32> to vector<16x16xf32>
    %c1_231 = arith.constant 1 : index
    %c23_232 = arith.constant 23 : index
    %299 = memref.load %arg2[%c1_231, %c23_232] : memref<2x49xf32, #tpu.memory_space<smem>>
    %300 = vector.broadcast %299 : f32 to vector<16x16xf32>
    %301 = arith.mulf %298, %300 : vector<16x16xf32>
    %302 = arith.addf %296, %301 : vector<16x16xf32>
    %c0_233 = arith.constant 0 : index
    %c3_234 = arith.constant 3 : index
    %c3_235 = arith.constant 3 : index
    %303 = vector.load %arg4[%c0_233, %c3_234, %c3_235] : memref<2x22x22xf32, #tpu.memory_space<vmem>>, vector<1x16x16xf32>
    %304 = vector.shape_cast %303 : vector<1x16x16xf32> to vector<16x16xf32>
    %c0_236 = arith.constant 0 : index
    %c24 = arith.constant 24 : index
    %305 = memref.load %arg2[%c0_236, %c24] : memref<2x49xf32, #tpu.memory_space<smem>>
    %306 = vector.broadcast %305 : f32 to vector<16x16xf32>
    %307 = arith.mulf %304, %306 : vector<16x16xf32>
    %308 = arith.addf %302, %307 : vector<16x16xf32>
    %c1_237 = arith.constant 1 : index
    %c3_238 = arith.constant 3 : index
    %c3_239 = arith.constant 3 : index
    %309 = vector.load %arg4[%c1_237, %c3_238, %c3_239] : memref<2x22x22xf32, #tpu.memory_space<vmem>>, vector<1x16x16xf32>
    %310 = vector.shape_cast %309 : vector<1x16x16xf32> to vector<16x16xf32>
    %c1_240 = arith.constant 1 : index
    %c24_241 = arith.constant 24 : index
    %311 = memref.load %arg2[%c1_240, %c24_241] : memref<2x49xf32, #tpu.memory_space<smem>>
    %312 = vector.broadcast %311 : f32 to vector<16x16xf32>
    %313 = arith.mulf %310, %312 : vector<16x16xf32>
    %314 = arith.addf %308, %313 : vector<16x16xf32>
    %c0_242 = arith.constant 0 : index
    %c3_243 = arith.constant 3 : index
    %c4_244 = arith.constant 4 : index
    %315 = vector.load %arg4[%c0_242, %c3_243, %c4_244] : memref<2x22x22xf32, #tpu.memory_space<vmem>>, vector<1x16x16xf32>
    %316 = vector.shape_cast %315 : vector<1x16x16xf32> to vector<16x16xf32>
    %c0_245 = arith.constant 0 : index
    %c25 = arith.constant 25 : index
    %317 = memref.load %arg2[%c0_245, %c25] : memref<2x49xf32, #tpu.memory_space<smem>>
    %318 = vector.broadcast %317 : f32 to vector<16x16xf32>
    %319 = arith.mulf %316, %318 : vector<16x16xf32>
    %320 = arith.addf %314, %319 : vector<16x16xf32>
    %c1_246 = arith.constant 1 : index
    %c3_247 = arith.constant 3 : index
    %c4_248 = arith.constant 4 : index
    %321 = vector.load %arg4[%c1_246, %c3_247, %c4_248] : memref<2x22x22xf32, #tpu.memory_space<vmem>>, vector<1x16x16xf32>
    %322 = vector.shape_cast %321 : vector<1x16x16xf32> to vector<16x16xf32>
    %c1_249 = arith.constant 1 : index
    %c25_250 = arith.constant 25 : index
    %323 = memref.load %arg2[%c1_249, %c25_250] : memref<2x49xf32, #tpu.memory_space<smem>>
    %324 = vector.broadcast %323 : f32 to vector<16x16xf32>
    %325 = arith.mulf %322, %324 : vector<16x16xf32>
    %326 = arith.addf %320, %325 : vector<16x16xf32>
    %c0_251 = arith.constant 0 : index
    %c3_252 = arith.constant 3 : index
    %c5_253 = arith.constant 5 : index
    %327 = vector.load %arg4[%c0_251, %c3_252, %c5_253] : memref<2x22x22xf32, #tpu.memory_space<vmem>>, vector<1x16x16xf32>
    %328 = vector.shape_cast %327 : vector<1x16x16xf32> to vector<16x16xf32>
    %c0_254 = arith.constant 0 : index
    %c26 = arith.constant 26 : index
    %329 = memref.load %arg2[%c0_254, %c26] : memref<2x49xf32, #tpu.memory_space<smem>>
    %330 = vector.broadcast %329 : f32 to vector<16x16xf32>
    %331 = arith.mulf %328, %330 : vector<16x16xf32>
    %332 = arith.addf %326, %331 : vector<16x16xf32>
    %c1_255 = arith.constant 1 : index
    %c3_256 = arith.constant 3 : index
    %c5_257 = arith.constant 5 : index
    %333 = vector.load %arg4[%c1_255, %c3_256, %c5_257] : memref<2x22x22xf32, #tpu.memory_space<vmem>>, vector<1x16x16xf32>
    %334 = vector.shape_cast %333 : vector<1x16x16xf32> to vector<16x16xf32>
    %c1_258 = arith.constant 1 : index
    %c26_259 = arith.constant 26 : index
    %335 = memref.load %arg2[%c1_258, %c26_259] : memref<2x49xf32, #tpu.memory_space<smem>>
    %336 = vector.broadcast %335 : f32 to vector<16x16xf32>
    %337 = arith.mulf %334, %336 : vector<16x16xf32>
    %338 = arith.addf %332, %337 : vector<16x16xf32>
    %c0_260 = arith.constant 0 : index
    %c3_261 = arith.constant 3 : index
    %c6_262 = arith.constant 6 : index
    %339 = vector.load %arg4[%c0_260, %c3_261, %c6_262] : memref<2x22x22xf32, #tpu.memory_space<vmem>>, vector<1x16x16xf32>
    %340 = vector.shape_cast %339 : vector<1x16x16xf32> to vector<16x16xf32>
    %c0_263 = arith.constant 0 : index
    %c27 = arith.constant 27 : index
    %341 = memref.load %arg2[%c0_263, %c27] : memref<2x49xf32, #tpu.memory_space<smem>>
    %342 = vector.broadcast %341 : f32 to vector<16x16xf32>
    %343 = arith.mulf %340, %342 : vector<16x16xf32>
    %344 = arith.addf %338, %343 : vector<16x16xf32>
    %c1_264 = arith.constant 1 : index
    %c3_265 = arith.constant 3 : index
    %c6_266 = arith.constant 6 : index
    %345 = vector.load %arg4[%c1_264, %c3_265, %c6_266] : memref<2x22x22xf32, #tpu.memory_space<vmem>>, vector<1x16x16xf32>
    %346 = vector.shape_cast %345 : vector<1x16x16xf32> to vector<16x16xf32>
    %c1_267 = arith.constant 1 : index
    %c27_268 = arith.constant 27 : index
    %347 = memref.load %arg2[%c1_267, %c27_268] : memref<2x49xf32, #tpu.memory_space<smem>>
    %348 = vector.broadcast %347 : f32 to vector<16x16xf32>
    %349 = arith.mulf %346, %348 : vector<16x16xf32>
    %350 = arith.addf %344, %349 : vector<16x16xf32>
    %c0_269 = arith.constant 0 : index
    %c4_270 = arith.constant 4 : index
    %c0_271 = arith.constant 0 : index
    %351 = vector.load %arg4[%c0_269, %c4_270, %c0_271] : memref<2x22x22xf32, #tpu.memory_space<vmem>>, vector<1x16x16xf32>
    %352 = vector.shape_cast %351 : vector<1x16x16xf32> to vector<16x16xf32>
    %c0_272 = arith.constant 0 : index
    %c28 = arith.constant 28 : index
    %353 = memref.load %arg2[%c0_272, %c28] : memref<2x49xf32, #tpu.memory_space<smem>>
    %354 = vector.broadcast %353 : f32 to vector<16x16xf32>
    %355 = arith.mulf %352, %354 : vector<16x16xf32>
    %356 = arith.addf %350, %355 : vector<16x16xf32>
    %c1_273 = arith.constant 1 : index
    %c4_274 = arith.constant 4 : index
    %c0_275 = arith.constant 0 : index
    %357 = vector.load %arg4[%c1_273, %c4_274, %c0_275] : memref<2x22x22xf32, #tpu.memory_space<vmem>>, vector<1x16x16xf32>
    %358 = vector.shape_cast %357 : vector<1x16x16xf32> to vector<16x16xf32>
    %c1_276 = arith.constant 1 : index
    %c28_277 = arith.constant 28 : index
    %359 = memref.load %arg2[%c1_276, %c28_277] : memref<2x49xf32, #tpu.memory_space<smem>>
    %360 = vector.broadcast %359 : f32 to vector<16x16xf32>
    %361 = arith.mulf %358, %360 : vector<16x16xf32>
    %362 = arith.addf %356, %361 : vector<16x16xf32>
    %c0_278 = arith.constant 0 : index
    %c4_279 = arith.constant 4 : index
    %c1_280 = arith.constant 1 : index
    %363 = vector.load %arg4[%c0_278, %c4_279, %c1_280] : memref<2x22x22xf32, #tpu.memory_space<vmem>>, vector<1x16x16xf32>
    %364 = vector.shape_cast %363 : vector<1x16x16xf32> to vector<16x16xf32>
    %c0_281 = arith.constant 0 : index
    %c29 = arith.constant 29 : index
    %365 = memref.load %arg2[%c0_281, %c29] : memref<2x49xf32, #tpu.memory_space<smem>>
    %366 = vector.broadcast %365 : f32 to vector<16x16xf32>
    %367 = arith.mulf %364, %366 : vector<16x16xf32>
    %368 = arith.addf %362, %367 : vector<16x16xf32>
    %c1_282 = arith.constant 1 : index
    %c4_283 = arith.constant 4 : index
    %c1_284 = arith.constant 1 : index
    %369 = vector.load %arg4[%c1_282, %c4_283, %c1_284] : memref<2x22x22xf32, #tpu.memory_space<vmem>>, vector<1x16x16xf32>
    %370 = vector.shape_cast %369 : vector<1x16x16xf32> to vector<16x16xf32>
    %c1_285 = arith.constant 1 : index
    %c29_286 = arith.constant 29 : index
    %371 = memref.load %arg2[%c1_285, %c29_286] : memref<2x49xf32, #tpu.memory_space<smem>>
    %372 = vector.broadcast %371 : f32 to vector<16x16xf32>
    %373 = arith.mulf %370, %372 : vector<16x16xf32>
    %374 = arith.addf %368, %373 : vector<16x16xf32>
    %c0_287 = arith.constant 0 : index
    %c4_288 = arith.constant 4 : index
    %c2_289 = arith.constant 2 : index
    %375 = vector.load %arg4[%c0_287, %c4_288, %c2_289] : memref<2x22x22xf32, #tpu.memory_space<vmem>>, vector<1x16x16xf32>
    %376 = vector.shape_cast %375 : vector<1x16x16xf32> to vector<16x16xf32>
    %c0_290 = arith.constant 0 : index
    %c30 = arith.constant 30 : index
    %377 = memref.load %arg2[%c0_290, %c30] : memref<2x49xf32, #tpu.memory_space<smem>>
    %378 = vector.broadcast %377 : f32 to vector<16x16xf32>
    %379 = arith.mulf %376, %378 : vector<16x16xf32>
    %380 = arith.addf %374, %379 : vector<16x16xf32>
    %c1_291 = arith.constant 1 : index
    %c4_292 = arith.constant 4 : index
    %c2_293 = arith.constant 2 : index
    %381 = vector.load %arg4[%c1_291, %c4_292, %c2_293] : memref<2x22x22xf32, #tpu.memory_space<vmem>>, vector<1x16x16xf32>
    %382 = vector.shape_cast %381 : vector<1x16x16xf32> to vector<16x16xf32>
    %c1_294 = arith.constant 1 : index
    %c30_295 = arith.constant 30 : index
    %383 = memref.load %arg2[%c1_294, %c30_295] : memref<2x49xf32, #tpu.memory_space<smem>>
    %384 = vector.broadcast %383 : f32 to vector<16x16xf32>
    %385 = arith.mulf %382, %384 : vector<16x16xf32>
    %386 = arith.addf %380, %385 : vector<16x16xf32>
    %c0_296 = arith.constant 0 : index
    %c4_297 = arith.constant 4 : index
    %c3_298 = arith.constant 3 : index
    %387 = vector.load %arg4[%c0_296, %c4_297, %c3_298] : memref<2x22x22xf32, #tpu.memory_space<vmem>>, vector<1x16x16xf32>
    %388 = vector.shape_cast %387 : vector<1x16x16xf32> to vector<16x16xf32>
    %c0_299 = arith.constant 0 : index
    %c31 = arith.constant 31 : index
    %389 = memref.load %arg2[%c0_299, %c31] : memref<2x49xf32, #tpu.memory_space<smem>>
    %390 = vector.broadcast %389 : f32 to vector<16x16xf32>
    %391 = arith.mulf %388, %390 : vector<16x16xf32>
    %392 = arith.addf %386, %391 : vector<16x16xf32>
    %c1_300 = arith.constant 1 : index
    %c4_301 = arith.constant 4 : index
    %c3_302 = arith.constant 3 : index
    %393 = vector.load %arg4[%c1_300, %c4_301, %c3_302] : memref<2x22x22xf32, #tpu.memory_space<vmem>>, vector<1x16x16xf32>
    %394 = vector.shape_cast %393 : vector<1x16x16xf32> to vector<16x16xf32>
    %c1_303 = arith.constant 1 : index
    %c31_304 = arith.constant 31 : index
    %395 = memref.load %arg2[%c1_303, %c31_304] : memref<2x49xf32, #tpu.memory_space<smem>>
    %396 = vector.broadcast %395 : f32 to vector<16x16xf32>
    %397 = arith.mulf %394, %396 : vector<16x16xf32>
    %398 = arith.addf %392, %397 : vector<16x16xf32>
    %c0_305 = arith.constant 0 : index
    %c4_306 = arith.constant 4 : index
    %c4_307 = arith.constant 4 : index
    %399 = vector.load %arg4[%c0_305, %c4_306, %c4_307] : memref<2x22x22xf32, #tpu.memory_space<vmem>>, vector<1x16x16xf32>
    %400 = vector.shape_cast %399 : vector<1x16x16xf32> to vector<16x16xf32>
    %c0_308 = arith.constant 0 : index
    %c32 = arith.constant 32 : index
    %401 = memref.load %arg2[%c0_308, %c32] : memref<2x49xf32, #tpu.memory_space<smem>>
    %402 = vector.broadcast %401 : f32 to vector<16x16xf32>
    %403 = arith.mulf %400, %402 : vector<16x16xf32>
    %404 = arith.addf %398, %403 : vector<16x16xf32>
    %c1_309 = arith.constant 1 : index
    %c4_310 = arith.constant 4 : index
    %c4_311 = arith.constant 4 : index
    %405 = vector.load %arg4[%c1_309, %c4_310, %c4_311] : memref<2x22x22xf32, #tpu.memory_space<vmem>>, vector<1x16x16xf32>
    %406 = vector.shape_cast %405 : vector<1x16x16xf32> to vector<16x16xf32>
    %c1_312 = arith.constant 1 : index
    %c32_313 = arith.constant 32 : index
    %407 = memref.load %arg2[%c1_312, %c32_313] : memref<2x49xf32, #tpu.memory_space<smem>>
    %408 = vector.broadcast %407 : f32 to vector<16x16xf32>
    %409 = arith.mulf %406, %408 : vector<16x16xf32>
    %410 = arith.addf %404, %409 : vector<16x16xf32>
    %c0_314 = arith.constant 0 : index
    %c4_315 = arith.constant 4 : index
    %c5_316 = arith.constant 5 : index
    %411 = vector.load %arg4[%c0_314, %c4_315, %c5_316] : memref<2x22x22xf32, #tpu.memory_space<vmem>>, vector<1x16x16xf32>
    %412 = vector.shape_cast %411 : vector<1x16x16xf32> to vector<16x16xf32>
    %c0_317 = arith.constant 0 : index
    %c33 = arith.constant 33 : index
    %413 = memref.load %arg2[%c0_317, %c33] : memref<2x49xf32, #tpu.memory_space<smem>>
    %414 = vector.broadcast %413 : f32 to vector<16x16xf32>
    %415 = arith.mulf %412, %414 : vector<16x16xf32>
    %416 = arith.addf %410, %415 : vector<16x16xf32>
    %c1_318 = arith.constant 1 : index
    %c4_319 = arith.constant 4 : index
    %c5_320 = arith.constant 5 : index
    %417 = vector.load %arg4[%c1_318, %c4_319, %c5_320] : memref<2x22x22xf32, #tpu.memory_space<vmem>>, vector<1x16x16xf32>
    %418 = vector.shape_cast %417 : vector<1x16x16xf32> to vector<16x16xf32>
    %c1_321 = arith.constant 1 : index
    %c33_322 = arith.constant 33 : index
    %419 = memref.load %arg2[%c1_321, %c33_322] : memref<2x49xf32, #tpu.memory_space<smem>>
    %420 = vector.broadcast %419 : f32 to vector<16x16xf32>
    %421 = arith.mulf %418, %420 : vector<16x16xf32>
    %422 = arith.addf %416, %421 : vector<16x16xf32>
    %c0_323 = arith.constant 0 : index
    %c4_324 = arith.constant 4 : index
    %c6_325 = arith.constant 6 : index
    %423 = vector.load %arg4[%c0_323, %c4_324, %c6_325] : memref<2x22x22xf32, #tpu.memory_space<vmem>>, vector<1x16x16xf32>
    %424 = vector.shape_cast %423 : vector<1x16x16xf32> to vector<16x16xf32>
    %c0_326 = arith.constant 0 : index
    %c34 = arith.constant 34 : index
    %425 = memref.load %arg2[%c0_326, %c34] : memref<2x49xf32, #tpu.memory_space<smem>>
    %426 = vector.broadcast %425 : f32 to vector<16x16xf32>
    %427 = arith.mulf %424, %426 : vector<16x16xf32>
    %428 = arith.addf %422, %427 : vector<16x16xf32>
    %c1_327 = arith.constant 1 : index
    %c4_328 = arith.constant 4 : index
    %c6_329 = arith.constant 6 : index
    %429 = vector.load %arg4[%c1_327, %c4_328, %c6_329] : memref<2x22x22xf32, #tpu.memory_space<vmem>>, vector<1x16x16xf32>
    %430 = vector.shape_cast %429 : vector<1x16x16xf32> to vector<16x16xf32>
    %c1_330 = arith.constant 1 : index
    %c34_331 = arith.constant 34 : index
    %431 = memref.load %arg2[%c1_330, %c34_331] : memref<2x49xf32, #tpu.memory_space<smem>>
    %432 = vector.broadcast %431 : f32 to vector<16x16xf32>
    %433 = arith.mulf %430, %432 : vector<16x16xf32>
    %434 = arith.addf %428, %433 : vector<16x16xf32>
    %c0_332 = arith.constant 0 : index
    %c5_333 = arith.constant 5 : index
    %c0_334 = arith.constant 0 : index
    %435 = vector.load %arg4[%c0_332, %c5_333, %c0_334] : memref<2x22x22xf32, #tpu.memory_space<vmem>>, vector<1x16x16xf32>
    %436 = vector.shape_cast %435 : vector<1x16x16xf32> to vector<16x16xf32>
    %c0_335 = arith.constant 0 : index
    %c35 = arith.constant 35 : index
    %437 = memref.load %arg2[%c0_335, %c35] : memref<2x49xf32, #tpu.memory_space<smem>>
    %438 = vector.broadcast %437 : f32 to vector<16x16xf32>
    %439 = arith.mulf %436, %438 : vector<16x16xf32>
    %440 = arith.addf %434, %439 : vector<16x16xf32>
    %c1_336 = arith.constant 1 : index
    %c5_337 = arith.constant 5 : index
    %c0_338 = arith.constant 0 : index
    %441 = vector.load %arg4[%c1_336, %c5_337, %c0_338] : memref<2x22x22xf32, #tpu.memory_space<vmem>>, vector<1x16x16xf32>
    %442 = vector.shape_cast %441 : vector<1x16x16xf32> to vector<16x16xf32>
    %c1_339 = arith.constant 1 : index
    %c35_340 = arith.constant 35 : index
    %443 = memref.load %arg2[%c1_339, %c35_340] : memref<2x49xf32, #tpu.memory_space<smem>>
    %444 = vector.broadcast %443 : f32 to vector<16x16xf32>
    %445 = arith.mulf %442, %444 : vector<16x16xf32>
    %446 = arith.addf %440, %445 : vector<16x16xf32>
    %c0_341 = arith.constant 0 : index
    %c5_342 = arith.constant 5 : index
    %c1_343 = arith.constant 1 : index
    %447 = vector.load %arg4[%c0_341, %c5_342, %c1_343] : memref<2x22x22xf32, #tpu.memory_space<vmem>>, vector<1x16x16xf32>
    %448 = vector.shape_cast %447 : vector<1x16x16xf32> to vector<16x16xf32>
    %c0_344 = arith.constant 0 : index
    %c36 = arith.constant 36 : index
    %449 = memref.load %arg2[%c0_344, %c36] : memref<2x49xf32, #tpu.memory_space<smem>>
    %450 = vector.broadcast %449 : f32 to vector<16x16xf32>
    %451 = arith.mulf %448, %450 : vector<16x16xf32>
    %452 = arith.addf %446, %451 : vector<16x16xf32>
    %c1_345 = arith.constant 1 : index
    %c5_346 = arith.constant 5 : index
    %c1_347 = arith.constant 1 : index
    %453 = vector.load %arg4[%c1_345, %c5_346, %c1_347] : memref<2x22x22xf32, #tpu.memory_space<vmem>>, vector<1x16x16xf32>
    %454 = vector.shape_cast %453 : vector<1x16x16xf32> to vector<16x16xf32>
    %c1_348 = arith.constant 1 : index
    %c36_349 = arith.constant 36 : index
    %455 = memref.load %arg2[%c1_348, %c36_349] : memref<2x49xf32, #tpu.memory_space<smem>>
    %456 = vector.broadcast %455 : f32 to vector<16x16xf32>
    %457 = arith.mulf %454, %456 : vector<16x16xf32>
    %458 = arith.addf %452, %457 : vector<16x16xf32>
    %c0_350 = arith.constant 0 : index
    %c5_351 = arith.constant 5 : index
    %c2_352 = arith.constant 2 : index
    %459 = vector.load %arg4[%c0_350, %c5_351, %c2_352] : memref<2x22x22xf32, #tpu.memory_space<vmem>>, vector<1x16x16xf32>
    %460 = vector.shape_cast %459 : vector<1x16x16xf32> to vector<16x16xf32>
    %c0_353 = arith.constant 0 : index
    %c37 = arith.constant 37 : index
    %461 = memref.load %arg2[%c0_353, %c37] : memref<2x49xf32, #tpu.memory_space<smem>>
    %462 = vector.broadcast %461 : f32 to vector<16x16xf32>
    %463 = arith.mulf %460, %462 : vector<16x16xf32>
    %464 = arith.addf %458, %463 : vector<16x16xf32>
    %c1_354 = arith.constant 1 : index
    %c5_355 = arith.constant 5 : index
    %c2_356 = arith.constant 2 : index
    %465 = vector.load %arg4[%c1_354, %c5_355, %c2_356] : memref<2x22x22xf32, #tpu.memory_space<vmem>>, vector<1x16x16xf32>
    %466 = vector.shape_cast %465 : vector<1x16x16xf32> to vector<16x16xf32>
    %c1_357 = arith.constant 1 : index
    %c37_358 = arith.constant 37 : index
    %467 = memref.load %arg2[%c1_357, %c37_358] : memref<2x49xf32, #tpu.memory_space<smem>>
    %468 = vector.broadcast %467 : f32 to vector<16x16xf32>
    %469 = arith.mulf %466, %468 : vector<16x16xf32>
    %470 = arith.addf %464, %469 : vector<16x16xf32>
    %c0_359 = arith.constant 0 : index
    %c5_360 = arith.constant 5 : index
    %c3_361 = arith.constant 3 : index
    %471 = vector.load %arg4[%c0_359, %c5_360, %c3_361] : memref<2x22x22xf32, #tpu.memory_space<vmem>>, vector<1x16x16xf32>
    %472 = vector.shape_cast %471 : vector<1x16x16xf32> to vector<16x16xf32>
    %c0_362 = arith.constant 0 : index
    %c38 = arith.constant 38 : index
    %473 = memref.load %arg2[%c0_362, %c38] : memref<2x49xf32, #tpu.memory_space<smem>>
    %474 = vector.broadcast %473 : f32 to vector<16x16xf32>
    %475 = arith.mulf %472, %474 : vector<16x16xf32>
    %476 = arith.addf %470, %475 : vector<16x16xf32>
    %c1_363 = arith.constant 1 : index
    %c5_364 = arith.constant 5 : index
    %c3_365 = arith.constant 3 : index
    %477 = vector.load %arg4[%c1_363, %c5_364, %c3_365] : memref<2x22x22xf32, #tpu.memory_space<vmem>>, vector<1x16x16xf32>
    %478 = vector.shape_cast %477 : vector<1x16x16xf32> to vector<16x16xf32>
    %c1_366 = arith.constant 1 : index
    %c38_367 = arith.constant 38 : index
    %479 = memref.load %arg2[%c1_366, %c38_367] : memref<2x49xf32, #tpu.memory_space<smem>>
    %480 = vector.broadcast %479 : f32 to vector<16x16xf32>
    %481 = arith.mulf %478, %480 : vector<16x16xf32>
    %482 = arith.addf %476, %481 : vector<16x16xf32>
    %c0_368 = arith.constant 0 : index
    %c5_369 = arith.constant 5 : index
    %c4_370 = arith.constant 4 : index
    %483 = vector.load %arg4[%c0_368, %c5_369, %c4_370] : memref<2x22x22xf32, #tpu.memory_space<vmem>>, vector<1x16x16xf32>
    %484 = vector.shape_cast %483 : vector<1x16x16xf32> to vector<16x16xf32>
    %c0_371 = arith.constant 0 : index
    %c39 = arith.constant 39 : index
    %485 = memref.load %arg2[%c0_371, %c39] : memref<2x49xf32, #tpu.memory_space<smem>>
    %486 = vector.broadcast %485 : f32 to vector<16x16xf32>
    %487 = arith.mulf %484, %486 : vector<16x16xf32>
    %488 = arith.addf %482, %487 : vector<16x16xf32>
    %c1_372 = arith.constant 1 : index
    %c5_373 = arith.constant 5 : index
    %c4_374 = arith.constant 4 : index
    %489 = vector.load %arg4[%c1_372, %c5_373, %c4_374] : memref<2x22x22xf32, #tpu.memory_space<vmem>>, vector<1x16x16xf32>
    %490 = vector.shape_cast %489 : vector<1x16x16xf32> to vector<16x16xf32>
    %c1_375 = arith.constant 1 : index
    %c39_376 = arith.constant 39 : index
    %491 = memref.load %arg2[%c1_375, %c39_376] : memref<2x49xf32, #tpu.memory_space<smem>>
    %492 = vector.broadcast %491 : f32 to vector<16x16xf32>
    %493 = arith.mulf %490, %492 : vector<16x16xf32>
    %494 = arith.addf %488, %493 : vector<16x16xf32>
    %c0_377 = arith.constant 0 : index
    %c5_378 = arith.constant 5 : index
    %c5_379 = arith.constant 5 : index
    %495 = vector.load %arg4[%c0_377, %c5_378, %c5_379] : memref<2x22x22xf32, #tpu.memory_space<vmem>>, vector<1x16x16xf32>
    %496 = vector.shape_cast %495 : vector<1x16x16xf32> to vector<16x16xf32>
    %c0_380 = arith.constant 0 : index
    %c40 = arith.constant 40 : index
    %497 = memref.load %arg2[%c0_380, %c40] : memref<2x49xf32, #tpu.memory_space<smem>>
    %498 = vector.broadcast %497 : f32 to vector<16x16xf32>
    %499 = arith.mulf %496, %498 : vector<16x16xf32>
    %500 = arith.addf %494, %499 : vector<16x16xf32>
    %c1_381 = arith.constant 1 : index
    %c5_382 = arith.constant 5 : index
    %c5_383 = arith.constant 5 : index
    %501 = vector.load %arg4[%c1_381, %c5_382, %c5_383] : memref<2x22x22xf32, #tpu.memory_space<vmem>>, vector<1x16x16xf32>
    %502 = vector.shape_cast %501 : vector<1x16x16xf32> to vector<16x16xf32>
    %c1_384 = arith.constant 1 : index
    %c40_385 = arith.constant 40 : index
    %503 = memref.load %arg2[%c1_384, %c40_385] : memref<2x49xf32, #tpu.memory_space<smem>>
    %504 = vector.broadcast %503 : f32 to vector<16x16xf32>
    %505 = arith.mulf %502, %504 : vector<16x16xf32>
    %506 = arith.addf %500, %505 : vector<16x16xf32>
    %c0_386 = arith.constant 0 : index
    %c5_387 = arith.constant 5 : index
    %c6_388 = arith.constant 6 : index
    %507 = vector.load %arg4[%c0_386, %c5_387, %c6_388] : memref<2x22x22xf32, #tpu.memory_space<vmem>>, vector<1x16x16xf32>
    %508 = vector.shape_cast %507 : vector<1x16x16xf32> to vector<16x16xf32>
    %c0_389 = arith.constant 0 : index
    %c41 = arith.constant 41 : index
    %509 = memref.load %arg2[%c0_389, %c41] : memref<2x49xf32, #tpu.memory_space<smem>>
    %510 = vector.broadcast %509 : f32 to vector<16x16xf32>
    %511 = arith.mulf %508, %510 : vector<16x16xf32>
    %512 = arith.addf %506, %511 : vector<16x16xf32>
    %c1_390 = arith.constant 1 : index
    %c5_391 = arith.constant 5 : index
    %c6_392 = arith.constant 6 : index
    %513 = vector.load %arg4[%c1_390, %c5_391, %c6_392] : memref<2x22x22xf32, #tpu.memory_space<vmem>>, vector<1x16x16xf32>
    %514 = vector.shape_cast %513 : vector<1x16x16xf32> to vector<16x16xf32>
    %c1_393 = arith.constant 1 : index
    %c41_394 = arith.constant 41 : index
    %515 = memref.load %arg2[%c1_393, %c41_394] : memref<2x49xf32, #tpu.memory_space<smem>>
    %516 = vector.broadcast %515 : f32 to vector<16x16xf32>
    %517 = arith.mulf %514, %516 : vector<16x16xf32>
    %518 = arith.addf %512, %517 : vector<16x16xf32>
    %c0_395 = arith.constant 0 : index
    %c6_396 = arith.constant 6 : index
    %c0_397 = arith.constant 0 : index
    %519 = vector.load %arg4[%c0_395, %c6_396, %c0_397] : memref<2x22x22xf32, #tpu.memory_space<vmem>>, vector<1x16x16xf32>
    %520 = vector.shape_cast %519 : vector<1x16x16xf32> to vector<16x16xf32>
    %c0_398 = arith.constant 0 : index
    %c42 = arith.constant 42 : index
    %521 = memref.load %arg2[%c0_398, %c42] : memref<2x49xf32, #tpu.memory_space<smem>>
    %522 = vector.broadcast %521 : f32 to vector<16x16xf32>
    %523 = arith.mulf %520, %522 : vector<16x16xf32>
    %524 = arith.addf %518, %523 : vector<16x16xf32>
    %c1_399 = arith.constant 1 : index
    %c6_400 = arith.constant 6 : index
    %c0_401 = arith.constant 0 : index
    %525 = vector.load %arg4[%c1_399, %c6_400, %c0_401] : memref<2x22x22xf32, #tpu.memory_space<vmem>>, vector<1x16x16xf32>
    %526 = vector.shape_cast %525 : vector<1x16x16xf32> to vector<16x16xf32>
    %c1_402 = arith.constant 1 : index
    %c42_403 = arith.constant 42 : index
    %527 = memref.load %arg2[%c1_402, %c42_403] : memref<2x49xf32, #tpu.memory_space<smem>>
    %528 = vector.broadcast %527 : f32 to vector<16x16xf32>
    %529 = arith.mulf %526, %528 : vector<16x16xf32>
    %530 = arith.addf %524, %529 : vector<16x16xf32>
    %c0_404 = arith.constant 0 : index
    %c6_405 = arith.constant 6 : index
    %c1_406 = arith.constant 1 : index
    %531 = vector.load %arg4[%c0_404, %c6_405, %c1_406] : memref<2x22x22xf32, #tpu.memory_space<vmem>>, vector<1x16x16xf32>
    %532 = vector.shape_cast %531 : vector<1x16x16xf32> to vector<16x16xf32>
    %c0_407 = arith.constant 0 : index
    %c43 = arith.constant 43 : index
    %533 = memref.load %arg2[%c0_407, %c43] : memref<2x49xf32, #tpu.memory_space<smem>>
    %534 = vector.broadcast %533 : f32 to vector<16x16xf32>
    %535 = arith.mulf %532, %534 : vector<16x16xf32>
    %536 = arith.addf %530, %535 : vector<16x16xf32>
    %c1_408 = arith.constant 1 : index
    %c6_409 = arith.constant 6 : index
    %c1_410 = arith.constant 1 : index
    %537 = vector.load %arg4[%c1_408, %c6_409, %c1_410] : memref<2x22x22xf32, #tpu.memory_space<vmem>>, vector<1x16x16xf32>
    %538 = vector.shape_cast %537 : vector<1x16x16xf32> to vector<16x16xf32>
    %c1_411 = arith.constant 1 : index
    %c43_412 = arith.constant 43 : index
    %539 = memref.load %arg2[%c1_411, %c43_412] : memref<2x49xf32, #tpu.memory_space<smem>>
    %540 = vector.broadcast %539 : f32 to vector<16x16xf32>
    %541 = arith.mulf %538, %540 : vector<16x16xf32>
    %542 = arith.addf %536, %541 : vector<16x16xf32>
    %c0_413 = arith.constant 0 : index
    %c6_414 = arith.constant 6 : index
    %c2_415 = arith.constant 2 : index
    %543 = vector.load %arg4[%c0_413, %c6_414, %c2_415] : memref<2x22x22xf32, #tpu.memory_space<vmem>>, vector<1x16x16xf32>
    %544 = vector.shape_cast %543 : vector<1x16x16xf32> to vector<16x16xf32>
    %c0_416 = arith.constant 0 : index
    %c44 = arith.constant 44 : index
    %545 = memref.load %arg2[%c0_416, %c44] : memref<2x49xf32, #tpu.memory_space<smem>>
    %546 = vector.broadcast %545 : f32 to vector<16x16xf32>
    %547 = arith.mulf %544, %546 : vector<16x16xf32>
    %548 = arith.addf %542, %547 : vector<16x16xf32>
    %c1_417 = arith.constant 1 : index
    %c6_418 = arith.constant 6 : index
    %c2_419 = arith.constant 2 : index
    %549 = vector.load %arg4[%c1_417, %c6_418, %c2_419] : memref<2x22x22xf32, #tpu.memory_space<vmem>>, vector<1x16x16xf32>
    %550 = vector.shape_cast %549 : vector<1x16x16xf32> to vector<16x16xf32>
    %c1_420 = arith.constant 1 : index
    %c44_421 = arith.constant 44 : index
    %551 = memref.load %arg2[%c1_420, %c44_421] : memref<2x49xf32, #tpu.memory_space<smem>>
    %552 = vector.broadcast %551 : f32 to vector<16x16xf32>
    %553 = arith.mulf %550, %552 : vector<16x16xf32>
    %554 = arith.addf %548, %553 : vector<16x16xf32>
    %c0_422 = arith.constant 0 : index
    %c6_423 = arith.constant 6 : index
    %c3_424 = arith.constant 3 : index
    %555 = vector.load %arg4[%c0_422, %c6_423, %c3_424] : memref<2x22x22xf32, #tpu.memory_space<vmem>>, vector<1x16x16xf32>
    %556 = vector.shape_cast %555 : vector<1x16x16xf32> to vector<16x16xf32>
    %c0_425 = arith.constant 0 : index
    %c45 = arith.constant 45 : index
    %557 = memref.load %arg2[%c0_425, %c45] : memref<2x49xf32, #tpu.memory_space<smem>>
    %558 = vector.broadcast %557 : f32 to vector<16x16xf32>
    %559 = arith.mulf %556, %558 : vector<16x16xf32>
    %560 = arith.addf %554, %559 : vector<16x16xf32>
    %c1_426 = arith.constant 1 : index
    %c6_427 = arith.constant 6 : index
    %c3_428 = arith.constant 3 : index
    %561 = vector.load %arg4[%c1_426, %c6_427, %c3_428] : memref<2x22x22xf32, #tpu.memory_space<vmem>>, vector<1x16x16xf32>
    %562 = vector.shape_cast %561 : vector<1x16x16xf32> to vector<16x16xf32>
    %c1_429 = arith.constant 1 : index
    %c45_430 = arith.constant 45 : index
    %563 = memref.load %arg2[%c1_429, %c45_430] : memref<2x49xf32, #tpu.memory_space<smem>>
    %564 = vector.broadcast %563 : f32 to vector<16x16xf32>
    %565 = arith.mulf %562, %564 : vector<16x16xf32>
    %566 = arith.addf %560, %565 : vector<16x16xf32>
    %c0_431 = arith.constant 0 : index
    %c6_432 = arith.constant 6 : index
    %c4_433 = arith.constant 4 : index
    %567 = vector.load %arg4[%c0_431, %c6_432, %c4_433] : memref<2x22x22xf32, #tpu.memory_space<vmem>>, vector<1x16x16xf32>
    %568 = vector.shape_cast %567 : vector<1x16x16xf32> to vector<16x16xf32>
    %c0_434 = arith.constant 0 : index
    %c46 = arith.constant 46 : index
    %569 = memref.load %arg2[%c0_434, %c46] : memref<2x49xf32, #tpu.memory_space<smem>>
    %570 = vector.broadcast %569 : f32 to vector<16x16xf32>
    %571 = arith.mulf %568, %570 : vector<16x16xf32>
    %572 = arith.addf %566, %571 : vector<16x16xf32>
    %c1_435 = arith.constant 1 : index
    %c6_436 = arith.constant 6 : index
    %c4_437 = arith.constant 4 : index
    %573 = vector.load %arg4[%c1_435, %c6_436, %c4_437] : memref<2x22x22xf32, #tpu.memory_space<vmem>>, vector<1x16x16xf32>
    %574 = vector.shape_cast %573 : vector<1x16x16xf32> to vector<16x16xf32>
    %c1_438 = arith.constant 1 : index
    %c46_439 = arith.constant 46 : index
    %575 = memref.load %arg2[%c1_438, %c46_439] : memref<2x49xf32, #tpu.memory_space<smem>>
    %576 = vector.broadcast %575 : f32 to vector<16x16xf32>
    %577 = arith.mulf %574, %576 : vector<16x16xf32>
    %578 = arith.addf %572, %577 : vector<16x16xf32>
    %c0_440 = arith.constant 0 : index
    %c6_441 = arith.constant 6 : index
    %c5_442 = arith.constant 5 : index
    %579 = vector.load %arg4[%c0_440, %c6_441, %c5_442] : memref<2x22x22xf32, #tpu.memory_space<vmem>>, vector<1x16x16xf32>
    %580 = vector.shape_cast %579 : vector<1x16x16xf32> to vector<16x16xf32>
    %c0_443 = arith.constant 0 : index
    %c47 = arith.constant 47 : index
    %581 = memref.load %arg2[%c0_443, %c47] : memref<2x49xf32, #tpu.memory_space<smem>>
    %582 = vector.broadcast %581 : f32 to vector<16x16xf32>
    %583 = arith.mulf %580, %582 : vector<16x16xf32>
    %584 = arith.addf %578, %583 : vector<16x16xf32>
    %c1_444 = arith.constant 1 : index
    %c6_445 = arith.constant 6 : index
    %c5_446 = arith.constant 5 : index
    %585 = vector.load %arg4[%c1_444, %c6_445, %c5_446] : memref<2x22x22xf32, #tpu.memory_space<vmem>>, vector<1x16x16xf32>
    %586 = vector.shape_cast %585 : vector<1x16x16xf32> to vector<16x16xf32>
    %c1_447 = arith.constant 1 : index
    %c47_448 = arith.constant 47 : index
    %587 = memref.load %arg2[%c1_447, %c47_448] : memref<2x49xf32, #tpu.memory_space<smem>>
    %588 = vector.broadcast %587 : f32 to vector<16x16xf32>
    %589 = arith.mulf %586, %588 : vector<16x16xf32>
    %590 = arith.addf %584, %589 : vector<16x16xf32>
    %c0_449 = arith.constant 0 : index
    %c6_450 = arith.constant 6 : index
    %c6_451 = arith.constant 6 : index
    %591 = vector.load %arg4[%c0_449, %c6_450, %c6_451] : memref<2x22x22xf32, #tpu.memory_space<vmem>>, vector<1x16x16xf32>
    %592 = vector.shape_cast %591 : vector<1x16x16xf32> to vector<16x16xf32>
    %c0_452 = arith.constant 0 : index
    %c48 = arith.constant 48 : index
    %593 = memref.load %arg2[%c0_452, %c48] : memref<2x49xf32, #tpu.memory_space<smem>>
    %594 = vector.broadcast %593 : f32 to vector<16x16xf32>
    %595 = arith.mulf %592, %594 : vector<16x16xf32>
    %596 = arith.addf %590, %595 : vector<16x16xf32>
    %c1_453 = arith.constant 1 : index
    %c6_454 = arith.constant 6 : index
    %c6_455 = arith.constant 6 : index
    %597 = vector.load %arg4[%c1_453, %c6_454, %c6_455] : memref<2x22x22xf32, #tpu.memory_space<vmem>>, vector<1x16x16xf32>
    %598 = vector.shape_cast %597 : vector<1x16x16xf32> to vector<16x16xf32>
    %c1_456 = arith.constant 1 : index
    %c48_457 = arith.constant 48 : index
    %599 = memref.load %arg2[%c1_456, %c48_457] : memref<2x49xf32, #tpu.memory_space<smem>>
    %600 = vector.broadcast %599 : f32 to vector<16x16xf32>
    %601 = arith.mulf %598, %600 : vector<16x16xf32>
    %602 = arith.addf %596, %601 : vector<16x16xf32>
    %603 = arith.negf %602 : vector<16x16xf32>
    %604 = math.exp %603 : vector<16x16xf32>
    %cst_458 = arith.constant 1.000000e+00 : f32
    %605 = vector.broadcast %cst_458 : f32 to vector<16x16xf32>
    %606 = arith.addf %605, %604 : vector<16x16xf32>
    %607 = arith.divf %605, %606 : vector<16x16xf32>
    %c0_459 = arith.constant 0 : index
    %c0_460 = arith.constant 0 : index
    %c0_461 = arith.constant 0 : index
    %c0_462 = arith.constant 0 : index
    %608 = vector.load %arg3[%c0_459, %c0_460, %c0_461, %c0_462] : memref<1x1x16x16xf32, #tpu.memory_space<vmem>>, vector<1x1x16x16xf32>
    %609 = vector.shape_cast %608 : vector<1x1x16x16xf32> to vector<16x16xf32>
    %610 = vector.shape_cast %607 : vector<16x16xf32> to vector<1x1x16x16xf32>
    tpu.vector_store %arg3[%c0_459, %c0_460, %c0_461, %c0_462], %610 {strides = array<i32>} : memref<1x1x16x16xf32, #tpu.memory_space<vmem>>, vector<1x1x16x16xf32>,
    return
  }
  func.func @transform_0(%arg0: i32) -> (i32, i32, i32, i32) {
    %c0_i32 = arith.constant 0 : i32
    %c0_i32_0 = arith.constant 0 : i32
    %c0_i32_1 = arith.constant 0 : i32
    %c0_i32_2 = arith.constant 0 : i32
    return %arg0, %c0_i32, %c0_i32_0, %c0_i32_1 : i32, i32, i32, i32
  }
  func.func @transform_1(%arg0: i32) -> (i32, i32) {
    %c0_i32 = arith.constant 0 : i32
    %c0_i32_0 = arith.constant 0 : i32
    %c0_i32_1 = arith.constant 0 : i32
    return %c0_i32, %c0_i32_0 : i32, i32
  }
  func.func @transform_2(%arg0: i32) -> (i32, i32, i32, i32) {
    %c0_i32 = arith.constant 0 : i32
    %c0_i32_0 = arith.constant 0 : i32
    %c0_i32_1 = arith.constant 0 : i32
    %c0_i32_2 = arith.constant 0 : i32
    return %arg0, %c0_i32, %c0_i32_0, %c0_i32_1 : i32, i32, i32, i32
  }
}

</mosaic_0001>

<bundles_post_ra>
// kernel: spatial_attention.1
= control target key start
LH: loop header
LB: loop body
LE: loop exit
PB: predicated region body
PF: predicated region fallthrough
CT: control target
= control target key end

     0   :  { %7 = vsyncpa [#allocation4], 0  ;;  %s2893_s0 = inlined_call_operand.hbm [shape: f32[2,4,16,16], index: 0, kind: input, shape index: {}]   ;;  %s2894_s1 = inlined_call_operand.vmem [shape: f32[2,49], index: 1, kind: input, shape index: {}]   ;;  %s2895_s2 = inlined_call_operand.hbm [shape: f32[2,1,16,16], index: 2, kind: output, shape index: {}]  }
   0x1   :  { %9 = vsyncpa [#allocation4 + $0x1], 0 }
   0x2   :  { %10 = vsyncpa [#allocation6], 0 }
   0x3   :  { %11 = vsyncpa [#allocation5], 0 }
   0x4   :  { %13 = vsyncpa [#allocation5 + $0x1], 0  ;;  %s2015_s9 = smov 0   ;;  %s2017_s10 = smov 0  }
   0x5   :  { %s2019_s11 = smov 0   ;;  %s2021_s12 = smov 0  }
   0x6 LB: > { %s2036_s13 = sadd.s32 4294967295, %s1985_s12   ;;  %s1676_s14 = sadd.s32 4294967294, %s1985_s12   ;;  %s1985_s12 = sphi %s2021_s12, %s2906_s12   ;;  %s1981_s11 = sphi %s2019_s11, %s2905_s11   ;;  %s1977_s10 = sphi %s2017_s10, %s2904_s10   ;;  %s1973_s9 = sphi %s2015_s9, %s2903_s9  }
   0x7   : > { %s2040_s15 = sadd.s32 1, %s1985_s12   ;;  %s26_s16 = sadd.s32 1, %s1981_s11 }
   0x8   : > { %s23_s17 = ssub.s32 %s1985_s12, %s2040_s15  ;;  %p33_p0 = scmp.ne.s32.totalorder %s1981_s11, %s1977_s10 }
   0x9   : > { %p24_p1 = scmp.eq.s32.totalorder %s23_s17, 0  ;;  %p34_p2 = scmp.eq.s32.totalorder %s1985_s12, 0 }
   0xa   : > { %p39_p3 = scmp.ne.s32.totalorder %s1977_s10, %s1973_s9  ;;  %p40_p4 = scmp.eq.s32.totalorder %s2036_s13, 0 }
   0xb   : > { %s2052_s18 = scalar_select %p24_p1, %s1981_s11, %s26_s16  }
   0xc   : > { %p2054_p5 = por %p34_p2, %p33_p0  ;;  %p2060_p6 = por %p40_p4, %p39_p3 }
   0xd   : > { %p84_p7 = scmp.eq.s32.totalorder %s2036_s13, 1  ;;  %p90_p8 = scmp.eq.s32.totalorder %s1676_s14, 1 }
   0xe   : > { %p1677_p9 = scmp.ge.s32.totalorder %s1985_s12, 1  ;;  %p97_p10 = scmp.lt.s32.totalorder %s1985_s12, 3 }
   0xf   : > { %p2067_p11 = por %p84_p7, %p33_p0  ;;  %p2071_p12 = por %p90_p8, %p39_p3 }
  0x10   : > { %p2075_p13 = pnand %p1677_p9, %p97_p10  ;;  %s109_s26 = sshll.u32 %s2894_s1, 4  ;;  %s110_s26 = int_to_ptr.vmem [resolvable:$true] %s109_s26 }
  0x11   : > { %p1814_p2 = scmp.lt.s32.totalorder %s1985_s12, 2  ;;  %s120_s27 = sand.u32 1, %s1981_s11  }
  0x12   : > { %p1801_p1 = pneg %p2075_p13  ;;  %s1680_s29 = sshll.u32 %s120_s27, 6 }
  0x13   : > { %p2091_p3 = pnand %p1814_p2, %p2054_p5  ;;  %s1987_s30 = smov [#allocation7]  }
  0x14   : > { %p1802_p7 = pnand %p1801_p1, %p40_p4  ;;  %s1791_s3 = sshll.u32 %s1985_s12, 6 }
  0x15   : > { %s124_s4 = scalar_lea.vmem [#allocation3], %s1680_s29  ;;  %s129_s8 = scalar_lea.hbm %s2893_s0, %s1791_s3 }
  0x16   : > { %1804 = dma.vmem_to_smem (!%p1802_p7), %s110_s26, 32, %s1987_s30, [#allocation6]  }
  0x17   : > { %s132_s5 = sshll.u32 %s124_s4, 4  ;;  %s130_s14 = sshll.u32 %s129_s8, 4  ;;  %s133_s5 = int_to_ptr.vmem [resolvable:$true] %s132_s5  ;;  %s131_s14 = int_to_ptr.hbm [resolvable:$true] %s130_s14 }
  0x18   : > { %s121_s16 = scalar_lea.sflag [#allocation4], %s120_s27  ;;  %s1885_s17 = sshra.s32 %s131_s14, 4  ;;  %s1886_s17 = int_to_ptr.hbm [resolvable:$true] %s1885_s17 }
  0x19   : > { %s1887_s19 = scalar_lea.hbm %s1886_s17, 64  ;;  %p1889_p8 = pneg %p2091_p3 }
  0x1a   : > { %p1888_p5 = scmp.ne.s32.totalorder %s1886_s17, %s1887_s19  ;;  %s1892_s26 = scalar_lea.hbm %s2893_s0, 128 }
  0x1b   : > { %p1893_p1 = scmp.lt.s32.totalorder %s1886_s17, %s2893_s0  ;;  %p1894_p2 = scmp.lt.s32.totalorder %s1892_s26, %s1887_s19 }
  0x1c   : > { %p1890_p9 = pnand %p1889_p8, %p1888_p5 }
  0x1d   : > { %p1895_p7 = por %p1894_p2, %p1893_p1 }
  0x1e   : > { %p1891_p10 = pneg %p1890_p9 }
  0x20   : > { %p1896_p0 = pnand %p1895_p7, %p1891_p10 }
  0x22   : > { %1899 = shalt.err (!%p1896_p0)
}
  0x23   : > { %s1988_s27 = smov 128   ;;  %s1989_s3 = smov 8  }
  0x24   : > { %1808 = dma.hbm_to_vmem [thread:$0]  (!%p2091_p3), %s131_s14, 1024, %s133_s5, %s121_s16, %s1988_s27, %s1988_s27, %s1989_s3  }
  0x25   : > { %144 = sbr.rel (%p2075_p13) target bundleno = 770 (0x302), region = 28  ;;  %s2112_s4 = sand.u32 (!%p2075_p13), 1, %s1977_s10  }
  0x26   : > { %s1684_s6 = sshll.u32 (!%p2075_p13), %s2112_s4, 6  ;;  %s147_s7 = scalar_lea.sflag (!%p2075_p13), [#allocation4], %s2112_s4 }
  0x27   : > { %s150_s8 = scalar_lea.vmem (!%p2075_p13), [#allocation3], %s1684_s6 }
  0x2a   : > { %1960 = dma.done.wait (%p2060_p6), %s147_s7, 1024  }
  0x2b   : > { %1962 = vsyncadd (%p2060_p6), %s147_s7, 4294966272 }
  0x2c   : > { %1964 = dma.done.wait (%p40_p4), [#allocation6], 32  }
  0x2d   : > { %1966 = vsyncadd (%p40_p4), [#allocation6], 4294967264 }
  0x2e   : > { %161 = sfence }
  0x2f   : > { %v178_v0 = vld [vmem:[%s150_s8] sm:$0xff]  ;;  %v180_v1 = vld [vmem:[%s150_s8 + $0x10] sm:$0xff]  ;;  %vm186_vm0 = vcmask 130048   ;;  %v179_v8 = vld [vmem:[%s150_s8 + $0x8] sm:$0xff]  ;;  %vm217_vm1 = vcmask 179200   ;;  %s1990_s20 = smov 3  }
  0x30   : > { %v182_v2 = vld [vmem:[%s150_s8 + $0x20] sm:$0xff]  ;;  %v184_v3 = vld [vmem:[%s150_s8 + $0x30] sm:$0xff]  ;;  %v188_v4 = vsel %vm186_vm0, %v180_v1, 0.0  ;;  %v203_v5 = vsel %vm186_vm0, %v178_v0, -inf  ;;  %v204_v6 = vsel %vm186_vm0, %v180_v1, -inf  ;;  %v187_v11 = vsel %vm186_vm0, %v178_v0, 0.0 }
  0x31   : > { %v205_v7 = vsel %vm186_vm0, %v182_v2, -inf  ;;  %v207_v10 = vsel %vm186_vm0, %v184_v3, -inf  ;;  %v190_v12 = vsel %vm186_vm0, %v182_v2, 0.0  ;;  %v181_v13 = vld [vmem:[%s150_s8 + $0x18] sm:$0xff]  ;;  %v183_v14 = vld [vmem:[%s150_s8 + $0x28] sm:$0xff]  ;;  %v189_v17 = vadd.f32 %v188_v4, %v187_v11  ;;  %s1689_s23 = sld [smem:[#allocation7 + $0x81]] }
  0x32   : > { %v206_v9 = vmax.f32 %v203_v5, %v205_v7  ;;  %v185_v15 = vld [vmem:[%s150_s8 + $0x38] sm:$0xff]  ;;  %v208_v16 = vmax.f32 %v204_v6, %v207_v10  ;;  %v192_v18 = vsel %vm186_vm0, %v184_v3, 0.0  ;;  %v194_v19 = vsel %vm186_vm0, %v179_v8, 0.0  ;;  %s2144_s28 = sld [smem:[#allocation7 + $0x80]]  ;;  %s1992_s17 = smov 127  }
  0x33   : > { %v195_v20 = vsel %vm186_vm0, %v181_v13, 0.0  ;;  %v210_v21 = vsel %vm186_vm0, %v179_v8, -inf  ;;  %v211_v22 = vsel %vm186_vm0, %v181_v13, -inf  ;;  %v212_v23 = vsel %vm186_vm0, %v183_v14, -inf  ;;  %s2147_s5 = sld [smem:[#allocation7]]  ;;  %s1993_s24 = smov 126  }
  0x34   : > { %v209_v24 = vmax.f32 %v206_v9, %v208_v16  ;;  %v191_v25 = vadd.f32 %v190_v12, %v189_v17  ;;  %v214_v26 = vsel %vm186_vm0, %v185_v15, -inf  ;;  %v196_v27 = vadd.f32 %v195_v20, %v194_v19  ;;  %s2150_s14 = sld [smem:[#allocation7 + $0x82]]  ;;  %s1994_s25 = smov 125  }
  0x35   : > { %v197_v28 = vsel %vm186_vm0, %v183_v14, 0.0  ;;  %v213_v30 = vmax.f32 %v210_v21, %v212_v23  ;;  %v215_v31 = vmax.f32 %v211_v22, %v214_v26  ;;  %v199_v33 = vsel %vm186_vm0, %v185_v15, 0.0  ;;  %s1693_s16 = sld [smem:[#allocation7 + $0x83]]  ;;  %s1995_s30 = smov 124  }
  0x36   : > { %238 = vrot.lane.b32.xlu1 %v209_v24, %s1990_s20  ;;  %v193_v29 = vadd.f32 %v192_v18, %v191_v25  ;;  %v198_v32 = vadd.f32 %v197_v28, %v196_v27  ;;  %v1991_v34 = vmov 0.0   ;;  %vm220_vm2 = vcmask 177152   ;;  %s1695_s19 = sld [smem:[#allocation7 + $0x84]]  ;;  %s1996_s3 = smov 123  }
  0x37   : > { %222 = vst.msk [vmem:[#allocation2 + $0x18] sm:$0xff] %vm217_vm1, %v1991_v34  ;;  %v216_v36 = vmax.f32 %v213_v30, %v215_v31  ;;  %vm233_vm3 = vcmask 154648   ;;  %v278_v41 = vstv %s1689_s23  ;;  %s1697_s26 = sld [smem:[#allocation7 + $0x85]]  ;;  %s1997_s6 = smov 122  }
  0x38   : > { %v201_v35 = vmul.f32 0.25, %v193_v29  ;;  %223 = vst.msk [vmem:[#allocation2 + $0x20] sm:$0xff] %vm217_vm1, %v1991_v34  ;;  %v200_v37 = vadd.f32 %v199_v33, %v198_v32  ;;  %v258_v45 = vstv %s2144_s28  ;;  %s1699_s29 = sld [smem:[#allocation7 + $0x86]] }
  0x39   : > { %218 = vst.msk [vmem:[#allocation2] sm:$0xff] %vm217_vm1, %v1991_v34  ;;  %v250_v46 = vstv %s2147_s5  ;;  %s1703_s27 = sld [smem:[#allocation7 + $0x88]] }
  0x3a   : > { %227 = vrot.lane.b32.xlu0 %v201_v35, %s1990_s20  ;;  %219 = vst.msk [vmem:[#allocation2 + $0x8] sm:$0xff] %vm217_vm1, %v1991_v34  ;;  %v202_v38 = vmul.f32 0.25, %v200_v37  ;;  %v306_v53 = vstv %s2150_s14  ;;  %s1705_s7 = sld [smem:[#allocation7 + $0x89]] }
  0x3b   : > { %224 = vst.msk [vmem:[#allocation2 + $0x28] sm:$0x3f] %vm220_vm2, %v1991_v34  ;;  %v334_v56 = vstv %s1693_s16  ;;  %s1707_s8 = sld [smem:[#allocation7 + $0x8a]] }
  0x3c   : > { %221 = vst.msk [vmem:[#allocation2 + $0x10] sm:$0x3f] %vm220_vm2, %v1991_v34  ;;  %v362_v62 = vstv %s1695_s19  ;;  %s2191_s23 = sld [smem:[#allocation7 + $0x2]] }
  0x3d   : > { %v390_v2 = vstv %s1697_s26  ;;  %s1711_s28 = sld [smem:[#allocation7 + $0x8c]] }
  0x3e   : > { %240 = vrot.lane.b32.xlu1 %v216_v36, %s1990_s20  ;;  %v418_v5 = vstv %s1699_s29  ;;  %s2199_s5 = sld [smem:[#allocation7 + $0x8d]] }
  0x3f   : > { %v462_v8 = vstv %s1703_s27  ;;  %s1692_s14 = sld [smem:[#allocation7 + $0x3]] }
  0x40   : > { %v490_v13 = vstv %s1705_s7  ;;  %s1688_s16 = sld [smem:[#allocation7 + $0x1]] }
  0x41   : > { %v518_v16 = vstv %s1707_s8  ;;  %s2209_s19 = sld [smem:[#allocation7 + $0x5]] }
  0x42   : > { %229 = vrot.lane.b32.xlu0 %v202_v38, %s1990_s20  ;;  %s1709_s20 = sld [smem:[#allocation7 + $0x8b]]  ;;  %v292_v22 = vstv %s2191_s23 }
  0x43   : > { %v574_v23 = vstv %s1711_s28  ;;  %s2219_s26 = sld [smem:[#allocation7 + $0x4]] }
  0x44   : > { %v602_v27 = vstv %s2199_s5  ;;  %s1698_s29 = sld [smem:[#allocation7 + $0x6]] }
  0x45   : > { %v320_v28 = vstv %s1692_s14  ;;  %s2229_s27 = sld [smem:[#allocation7 + $0x9]] }
  0x46   : > { %v264_v32 = vstv %s1688_s16  ;;  %s2237_s7 = sld [smem:[#allocation7 + $0x8]] }
  0x47   : > { %v376_v33 = vstv %s2209_s19  ;;  %s1706_s8 = sld [smem:[#allocation7 + $0xa]] }
  0x48   : > { %v546_v18 = vstv %s1709_s20  ;;  %s2251_s20 = sld [smem:[#allocation7 + $0xc]] }
  0x49   : > { %v348_v37 = vstv %s2219_s26  ;;  %s2261_s23 = sld [smem:[#allocation7 + $0xb]] }
  0x4a   : > { %v404_v38 = vstv %s1698_s29  ;;  %s1712_s28 = sld [smem:[#allocation7 + $0xd]] }
  0x4b   : > { %s2283_s14 = sld [smem:[#allocation7 + $0xf]] }
  0x4c   : > { %s1717_s16 = sld [smem:[#allocation7 + $0x8f]] }
  0x4d   : > { %s2304_s5 = sld [smem:[#allocation7 + $0x10]] }
  0x4e   : > { %s2320_s19 = sld [smem:[#allocation7 + $0x90]] }
  0x4f   : > { %s1720_s26 = sld [smem:[#allocation7 + $0x11]] }
  0x50   : > { %s2340_s29 = sld [smem:[#allocation7 + $0x91]] }
  0xa8   : > { %v239_v39 = vpop.permute.xlu1 %238 }
  0xa9   : > { %245 = vst.msk [vmem:[#allocation2 + $0x1b] sm:$0xff] %vm233_vm3, %v239_v39 }
  0xac   : > { %v228_v40 = vpop.permute.xlu0 %227 }
  0xad   : > { %234 = vst.msk [vmem:[#allocation2 + $0x3] sm:$0xff] %vm233_vm3, %v228_v40 }
  0xb0   : > { %v255_v42 = vld [vmem:[#allocation2 + $0x18] sm:$0xff]  ;;  %v241_v43 = vpop.permute.xlu1 %240 }
  0xb1   : > { %246 = vst.msk [vmem:[#allocation2 + $0x23] sm:$0xff] %vm233_vm3, %v241_v43  ;;  %v279_v44 = vmul.f32 %v278_v41, %v255_v42  ;;  %v259_v49 = vmul.f32 %v258_v45, %v255_v42  ;;  %v307_v63 = vmul.f32 %v306_v53, %v255_v42  ;;  %v335_v0 = vmul.f32 %v334_v56, %v255_v42  ;;  %v2177_v7 = vld [vmem:[#allocation2 + $0x19] sm:$0xff] }
  0xb2   : > { %v363_v1 = vmul.f32 %v362_v62, %v255_v42  ;;  %v419_v9 = vmul.f32 %v418_v5, %v255_v42  ;;  %v391_v10 = vmul.f32 %v390_v2, %v255_v42  ;;  %v463_v11 = vmul.f32 %v462_v8, %v2177_v7 }
  0xb3   : > { %283 = vrot.lane.b32.xlu0 %v279_v44, %s1992_s17  ;;  %v519_v19 = vmul.f32 %v518_v16, %v2177_v7  ;;  %v491_v20 = vmul.f32 %v490_v13, %v2177_v7  ;;  %v547_v21 = vmul.f32 %v546_v18, %v2177_v7  ;;  %v603_v29 = vmul.f32 %v602_v27, %v2177_v7 }
  0xb4   : > { %v2156_v47 = vld [vmem:[#allocation2] sm:$0xff]  ;;  %v230_v48 = vpop.permute.xlu0 %229  ;;  %v575_v30 = vmul.f32 %v574_v23, %v2177_v7  ;;  %v476_v43 = vstv %s2229_s27  ;;  %s2352_s27 = sld [smem:[#allocation7 + $0x12]] }
  0xb5   : > { %v251_v50 = vmul.f32 %v250_v46, %v2156_v47  ;;  %235 = vst.msk [vmem:[#allocation2 + $0xb] sm:$0xff] %vm233_vm3, %v230_v48  ;;  %v321_v31 = vmul.f32 %v320_v28, %v2156_v47  ;;  %v265_v34 = vmul.f32 %v264_v32, %v2156_v47  ;;  %v349_v39 = vmul.f32 %v348_v37, %v2156_v47  ;;  %v2248_v48 = vld [vmem:[#allocation2 + $0x1] sm:$0xff] }
  0xb7   : > { %v2160_v51 = vadd.f32 %v259_v49, %v251_v50  ;;  %v448_v49 = vstv %s2237_s7  ;;  %v504_v50 = vstv %s1706_s8  ;;  %s1723_s7 = sld [smem:[#allocation7 + $0x92]] }
  0xb8   : > { %v256_v52 = vld [vmem:[#allocation2 + $0x20] sm:$0xff]  ;;  %s2368_s8 = sld [smem:[#allocation7 + $0x13]] }
  0xb9   : > { %v308_v54 = vmul.f32 %v306_v53, %v256_v52  ;;  %v280_v55 = vmul.f32 %v278_v41, %v256_v52  ;;  %v336_v57 = vmul.f32 %v334_v56, %v256_v52  ;;  %v260_v59 = vmul.f32 %v258_v45, %v256_v52  ;;  %v2183_v12 = vld [vmem:[#allocation2 + $0x21] sm:$0xff] }
  0xba   : > { %v392_v3 = vmul.f32 %v390_v2, %v256_v52  ;;  %v364_v4 = vmul.f32 %v362_v62, %v256_v52  ;;  %v420_v6 = vmul.f32 %v418_v5, %v256_v52  ;;  %v492_v14 = vmul.f32 %v490_v13, %v2183_v12 }
  0xbb   : > { %313 = vrot.lane.b32.xlu2 %v308_v54, %s1993_s24  ;;  %285 = vrot.lane.b32.xlu1 %v280_v55, %s1992_s17  ;;  %v464_v15 = vmul.f32 %v462_v8, %v2183_v12  ;;  %v520_v17 = vmul.f32 %v518_v16, %v2183_v12  ;;  %v576_v24 = vmul.f32 %v574_v23, %v2183_v12  ;;  %v560_v56 = vstv %s2251_s20  ;;  %s2381_s20 = sld [smem:[#allocation7 + $0x93]] }
  0xbc   : > { %v2165_v58 = vld [vmem:[#allocation2 + $0x8] sm:$0xff]  ;;  %341 = vrot.lane.b32.xlu0 %v336_v57, %s1994_s25  ;;  %v548_v25 = vmul.f32 %v546_v18, %v2183_v12  ;;  %v405_v41 = vmul.f32 %v404_v38, %v2156_v47  ;;  %v293_v45 = vmul.f32 %v292_v22, %v2156_v47  ;;  %v449_v52 = vmul.f32 %v448_v49, %v2248_v48 }
  0xbd   : > { %v252_v60 = vmul.f32 %v250_v46, %v2165_v58  ;;  %v294_v26 = vmul.f32 %v292_v22, %v2165_v58  ;;  %v322_v35 = vmul.f32 %v320_v28, %v2165_v58  ;;  %v378_v36 = vmul.f32 %v376_v33, %v2165_v58  ;;  %v2239_v42 = vld [vmem:[#allocation2 + $0x9] sm:$0xff] }
  0xbe   : > { %v266_v40 = vmul.f32 %v264_v32, %v2165_v58  ;;  %v406_v44 = vmul.f32 %v404_v38, %v2165_v58  ;;  %v478_v46 = vmul.f32 %v476_v43, %v2239_v42  ;;  %v350_v53 = vmul.f32 %v348_v37, %v2165_v58  ;;  %v2318_v22 = vld [vmem:[#allocation2 + $0x22] sm:$0xff]  ;;  %v2322_v23 = vld [vmem:[#allocation2 + $0xa] sm:$0xff] }
  0xbf   : > { %v2169_v61 = vadd.f32 %v260_v59, %v252_v60  ;;  %v505_v54 = vmul.f32 %v504_v50, %v2248_v48  ;;  %v506_v57 = vmul.f32 %v504_v50, %v2239_v42  ;;  %v377_v59 = vmul.f32 %v376_v33, %v2156_v47 }
  0xc0   : > { %v562_v58 = vmul.f32 %v560_v56, %v2239_v42  ;;  %v532_v62 = vstv %s2261_s23  ;;  %v477_v5 = vmul.f32 %v476_v43, %v2248_v48  ;;  %v632_v13 = vstv %s2283_s14  ;;  %s1726_s23 = sld [smem:[#allocation7 + $0x14]] }
  0xc1   : > { %v688_v32 = vstv %s1720_s26  ;;  %v730_v50 = vstv %s1723_s7  ;;  %s2406_s14 = sld [smem:[#allocation7 + $0x16]] }
  0xc2   : > { %s2438_s26 = sld [smem:[#allocation7 + $0x7]] }
  0xc3   : > { %339 = vrot.lane.b32.xlu2 %v335_v0, %s1994_s25  ;;  %311 = vrot.lane.b32.xlu1 %v307_v63, %s1993_s24  ;;  %v588_v63 = vstv %s1712_s28  ;;  %v533_v0 = vmul.f32 %v532_v62, %v2248_v48  ;;  %s2397_s28 = sld [smem:[#allocation7 + $0x94]] }
  0xc4   : > { %367 = vrot.lane.b32.xlu0 %v363_v1, %s1995_s30  ;;  %v450_v1 = vmul.f32 %v448_v49, %v2239_v42  ;;  %v589_v2 = vmul.f32 %v588_v63, %v2248_v48  ;;  %v716_v49 = vstv %s2352_s27  ;;  %s2446_s27 = sld [smem:[#allocation7 + $0x18]] }
  0xc5   : > { %s2469_s7 = sld [smem:[#allocation7 + $0x98]] }
  0xcb   : > { %397 = vrot.lane.b32.xlu2 %v392_v3, %s1996_s3  ;;  %369 = vrot.lane.b32.xlu1 %v364_v4, %s1995_s30  ;;  %v590_v4 = vmul.f32 %v588_v63, %v2239_v42  ;;  %v732_v63 = vmul.f32 %v730_v50, %v2318_v22 }
  0xcc   : > { %425 = vrot.lane.b32.xlu0 %v420_v6, %s1997_s6  ;;  %v604_v6 = vmul.f32 %v602_v27, %v2183_v12 }
  0xd3   : > { %423 = vrot.lane.b32.xlu2 %v419_v9, %s1997_s6  ;;  %395 = vrot.lane.b32.xlu1 %v391_v10, %s1996_s3 }
  0xd4   : > { %467 = vrot.lane.b32.xlu0 %v463_v11, %s1992_s17  ;;  %v2299_v11 = vld [vmem:[#allocation2 + $0x2] sm:$0xff] }
  0xd5   : > { %v633_v16 = vmul.f32 %v632_v13, %v2299_v11 }
  0xdb   : > { %497 = vrot.lane.b32.xlu2 %v492_v14, %s1993_s24  ;;  %469 = vrot.lane.b32.xlu1 %v464_v15, %s1992_s17  ;;  %v2302_v14 = vld [vmem:[#allocation2 + $0x1a] sm:$0xff]  ;;  %v646_v15 = vstv %s1717_s16  ;;  %s2408_s16 = sld [smem:[#allocation7 + $0x96]] }
  0xdc   : > { %525 = vrot.lane.b32.xlu0 %v520_v17, %s1994_s25  ;;  %v534_v17 = vmul.f32 %v532_v62, %v2239_v42  ;;  %v647_v18 = vmul.f32 %v646_v15, %v2302_v14  ;;  %v744_v62 = vstv %s2368_s8  ;;  %s2476_s8 = sld [smem:[#allocation7 + $0x19]] }
  0xe3   : > { %523 = vrot.lane.b32.xlu2 %v519_v19, %s1994_s25  ;;  %495 = vrot.lane.b32.xlu1 %v491_v20, %s1993_s24 }
  0xe4   : > { %551 = vrot.lane.b32.xlu0 %v547_v21, %s1995_s30 }
  0xeb   : > { %581 = vrot.lane.b32.xlu2 %v576_v24, %s1996_s3  ;;  %553 = vrot.lane.b32.xlu1 %v548_v25, %s1995_s30  ;;  %v660_v24 = vstv %s2304_s5  ;;  %v648_v25 = vmul.f32 %v646_v15, %v2318_v22  ;;  %s2428_s5 = sld [smem:[#allocation7 + $0x17]] }
  0xec   : > { %299 = vrot.lane.b32.xlu0 %v294_v26, %s1993_s24  ;;  %v561_v26 = vmul.f32 %v560_v56, %v2248_v48  ;;  %v662_v27 = vmul.f32 %v660_v24, %v2322_v23 }
  0xf3   : > { %607 = vrot.lane.b32.xlu2 %v603_v29, %s1997_s6  ;;  %579 = vrot.lane.b32.xlu1 %v575_v30, %s1996_s3 }
  0xf4   : > { %325 = vrot.lane.b32.xlu0 %v321_v31, %s1994_s25  ;;  %v674_v31 = vstv %s2320_s19  ;;  %s2433_s19 = sld [smem:[#allocation7 + $0x87]] }
  0xf5   : > { %v675_v33 = vmul.f32 %v674_v31, %v2302_v14 }
  0xfb   : > { %269 = vrot.lane.b32.xlu2 %v265_v34, %s1992_s17  ;;  %327 = vrot.lane.b32.xlu1 %v322_v35, %s1994_s25  ;;  %v634_v34 = vmul.f32 %v632_v13, %v2322_v23  ;;  %v689_v35 = vmul.f32 %v688_v32, %v2299_v11  ;;  %v772_v13 = vstv %s1726_s23  ;;  %s2496_s23 = sld [smem:[#allocation7 + $0x1a]] }
  0xfc   : > { %383 = vrot.lane.b32.xlu0 %v378_v36, %s1996_s3 }
 0x103   : > { %353 = vrot.lane.b32.xlu1 %v349_v39, %s1995_s30  ;;  %271 = vrot.lane.b32.xlu2 %v266_v40, %s1992_s17  ;;  %v690_v39 = vmul.f32 %v688_v32, %v2322_v23  ;;  %v702_v40 = vstv %s2340_s29  ;;  %v774_v32 = vmul.f32 %v772_v13, %v2322_v23  ;;  %s2442_s29 = sld [smem:[#allocation7 + $0x97]] }
 0x104   : > { %409 = vrot.lane.b32.xlu0 %v405_v41, %s1997_s6  ;;  %v661_v41 = vmul.f32 %v660_v24, %v2299_v11  ;;  %v704_v43 = vmul.f32 %v702_v40, %v2318_v22  ;;  %v773_v24 = vmul.f32 %v772_v13, %v2299_v11  ;;  %v2444_v13 = vld [vmem:[#allocation2 + $0xb] sm:$0xff] }
 0x10b   : > { %411 = vrot.lane.b32.xlu1 %v406_v44, %s1997_s6  ;;  %297 = vrot.lane.b32.xlu2 %v293_v45, %s1993_s24 }
 0x10c   : > { %483 = vrot.lane.b32.xlu0 %v478_v46, %s1993_s24 }
 0x113   : > { %453 = vrot.lane.b32.xlu1 %v449_v52, %s1992_s17  ;;  %355 = vrot.lane.b32.xlu2 %v350_v53, %s1995_s30  ;;  %v717_v52 = vmul.f32 %v716_v49, %v2299_v11  ;;  %v676_v53 = vmul.f32 %v674_v31, %v2318_v22 }
 0x114   : > { %509 = vrot.lane.b32.xlu0 %v505_v54, %s1994_s25  ;;  %v731_v54 = vmul.f32 %v730_v50, %v2302_v14  ;;  %v816_v50 = vstv %s2406_s14  ;;  %s1714_s14 = sld [smem:[#allocation7 + $0xe]] }
 0x115   : > { %v2259_v55 = vpop.permute.xlu2 %313 }
 0x11b   : > { %511 = vrot.lane.b32.xlu1 %v506_v57, %s1994_s25  ;;  %381 = vrot.lane.b32.xlu2 %v377_v59, %s1996_s3 }
 0x11c   : > { %567 = vrot.lane.b32.xlu0 %v562_v58, %s1996_s3 }
 0x11d   : > { %v2270_v60 = vpop.permute.xlu2 %339 }
 0x123   : > { %537 = vrot.lane.b32.xlu1 %v533_v0, %s1995_s30  ;;  %455 = vrot.lane.b32.xlu2 %v450_v1, %s1992_s17  ;;  %v703_v0 = vmul.f32 %v702_v40, %v2302_v14  ;;  %v746_v1 = vmul.f32 %v744_v62, %v2322_v23 }
 0x124   : > { %593 = vrot.lane.b32.xlu0 %v589_v2, %s1997_s6 }
 0x125   : > { %v2279_v47 = vpop.permute.xlu2 %397  ;;  %v2281_v3 = vpop.permute.xlu0 %283 }
 0x12b   : > { %595 = vrot.lane.b32.xlu1 %v590_v4, %s1997_s6  ;;  %481 = vrot.lane.b32.xlu2 %v477_v5, %s1993_s24 }
 0x12c   : > { %609 = vrot.lane.b32.xlu0 %v604_v6, %s1997_s6  ;;  %v758_v6 = vstv %s2381_s20  ;;  %s2478_s20 = sld [smem:[#allocation7 + $0x99]] }
 0x12d   : > { %v2293_v8 = vpop.permute.xlu2 %423  ;;  %v2295_v9 = vpop.permute.xlu1 %285 }
 0x12e   : > { %v2297_v10 = vpop.permute.xlu0 %341 }
 0x133   : > { %637 = vrot.lane.b32.xlu1 %v633_v16, %s1992_s17  ;;  %539 = vrot.lane.b32.xlu2 %v534_v17, %s1995_s30  ;;  %v759_v16 = vmul.f32 %v758_v6, %v2302_v14  ;;  %v718_v17 = vmul.f32 %v716_v49, %v2322_v23  ;;  %v2419_v49 = vld [vmem:[#allocation2 + $0x3] sm:$0xff] }
 0x134   : > { %651 = vrot.lane.b32.xlu0 %v647_v18, %s1992_s17 }
 0x135   : > { %v2312_v19 = vpop.permute.xlu2 %497  ;;  %v2314_v20 = vpop.permute.xlu1 %311 }
 0x136   : > { %v2316_v21 = vpop.permute.xlu0 %367 }
 0x13b   : > { %653 = vrot.lane.b32.xlu1 %v648_v25, %s1992_s17  ;;  %565 = vrot.lane.b32.xlu2 %v561_v26, %s1996_s3 }
 0x13c   : > { %667 = vrot.lane.b32.xlu0 %v662_v27, %s1993_s24 }
 0x13d   : > { %v2331_v28 = vpop.permute.xlu2 %523  ;;  %v2333_v29 = vpop.permute.xlu1 %369 }
 0x13e   : > { %v2335_v30 = vpop.permute.xlu0 %425 }
 0x143   : > { %679 = vrot.lane.b32.xlu1 %v675_v33, %s1993_s24  ;;  %639 = vrot.lane.b32.xlu2 %v634_v34, %s1992_s17  ;;  %v786_v33 = vstv %s2397_s28  ;;  %s2504_s28 = sld [smem:[#allocation7 + $0x8e]] }
 0x144   : > { %693 = vrot.lane.b32.xlu0 %v689_v35, %s1994_s25  ;;  %v788_v35 = vmul.f32 %v786_v33, %v2318_v22 }
 0x145   : > { %v2346_v36 = vpop.permute.xlu2 %581  ;;  %v2348_v37 = vpop.permute.xlu1 %395 }
 0x146   : > { %v2350_v38 = vpop.permute.xlu0 %467 }
 0x14b   : > { %695 = vrot.lane.b32.xlu1 %v690_v39, %s1994_s25  ;;  %665 = vrot.lane.b32.xlu2 %v661_v41, %s1993_s24 }
 0x14c   : > { %709 = vrot.lane.b32.xlu0 %v704_v43, %s1994_s25 }
 0x14d   : > { %v2361_v44 = vpop.permute.xlu2 %607  ;;  %v2363_v45 = vpop.permute.xlu1 %469 }
 0x14e   : > { %v2365_v46 = vpop.permute.xlu0 %525 }
 0x153   : > { %721 = vrot.lane.b32.xlu1 %v717_v52, %s1995_s30  ;;  %681 = vrot.lane.b32.xlu2 %v676_v53, %s1993_s24  ;;  %v2422_v52 = vld [vmem:[#allocation2 + $0x1b] sm:$0xff]  ;;  %v830_v53 = vstv %s2408_s16  ;;  %s2506_s16 = sld [smem:[#allocation7 + $0x9a]] }
 0x154   : > { %735 = vrot.lane.b32.xlu0 %v731_v54, %s1995_s30 }
 0x155   : > { %v2376_v56 = vpop.permute.xlu1 %495  ;;  %v270_v57 = vpop.permute.xlu2 %269 }
 0x156   : > { %v275_v59 = vadd.f32 %v270_v57, %v2160_v51  ;;  %v2379_v58 = vpop.permute.xlu0 %551  ;;  %v817_v57 = vmul.f32 %v816_v50, %v2419_v49 }
 0x15b   : > { %737 = vrot.lane.b32.xlu1 %v732_v63, %s1995_s30  ;;  %707 = vrot.lane.b32.xlu2 %v703_v0, %s1994_s25 }
 0x15c   : > { %751 = vrot.lane.b32.xlu0 %v746_v1, %s1996_s3 }
 0x15d   : > { %v2390_v51 = vpop.permute.xlu1 %553  ;;  %v272_v2 = vpop.permute.xlu2 %271 }
 0x15e   : > { %v276_v4 = vadd.f32 %v272_v2, %v2169_v61  ;;  %v300_v5 = vpop.permute.xlu0 %299  ;;  %v289_v61 = vadd.f32 %v2281_v3, %v275_v59  ;;  %v745_v3 = vmul.f32 %v744_v62, %v2299_v11  ;;  %v760_v59 = vmul.f32 %v758_v6, %v2318_v22  ;;  %v2440_v6 = vld [vmem:[#allocation2 + $0x23] sm:$0xff] }
 0x15f   : > { %v831_v62 = vmul.f32 %v830_v53, %v2422_v52 }
 0x160   : > { %v290_v15 = vadd.f32 %v2295_v9, %v276_v4 }
 0x162   : > { %v304_v18 = vadd.f32 %v300_v5, %v290_v15  ;;  %v844_v15 = vstv %s2428_s5  ;;  %s2508_s5 = sld [smem:[#allocation7 + $0x1b]] }
 0x163   : > { %763 = vrot.lane.b32.xlu1 %v759_v16, %s1996_s3  ;;  %723 = vrot.lane.b32.xlu2 %v718_v17, %s1995_s30  ;;  %v787_v16 = vmul.f32 %v786_v33, %v2302_v14 }
 0x164   : > { %777 = vrot.lane.b32.xlu0 %v773_v24, %s1997_s6  ;;  %v318_v39 = vadd.f32 %v2259_v55, %v304_v18  ;;  %v846_v18 = vmul.f32 %v844_v15, %v2444_v13 }
 0x165   : > { %v2404_v25 = vpop.permute.xlu1 %579  ;;  %v298_v9 = vpop.permute.xlu2 %297 }
 0x166   : > { %v303_v26 = vadd.f32 %v298_v9, %v289_v61  ;;  %v326_v27 = vpop.permute.xlu0 %325 }
 0x168   : > { %v317_v31 = vadd.f32 %v2314_v20, %v303_v26 }
 0x16a   : > { %v331_v34 = vadd.f32 %v326_v27, %v317_v31  ;;  %v442_v27 = vstv %s2433_s19  ;;  %s2529_s19 = sld [smem:[#allocation7 + $0x9b]] }
 0x16b   : > { %779 = vrot.lane.b32.xlu1 %v774_v32, %s1997_s6  ;;  %749 = vrot.lane.b32.xlu2 %v745_v3, %s1996_s3  ;;  %v858_v3 = vstv %s2442_s29  ;;  %s2538_s29 = sld [smem:[#allocation7 + $0x9d]] }
 0x16c   : > { %793 = vrot.lane.b32.xlu0 %v788_v35, %s1997_s6  ;;  %v345_v63 = vadd.f32 %v2270_v60, %v331_v34  ;;  %v872_v34 = vstv %s2446_s27  ;;  %s2555_s27 = sld [smem:[#allocation7 + $0x1e]] }
 0x16d   : > { %v328_v40 = vpop.permute.xlu1 %327  ;;  %v356_v41 = vpop.permute.xlu2 %355 }
 0x16e   : > { %v332_v20 = vadd.f32 %v328_v40, %v318_v39  ;;  %v384_v43 = vpop.permute.xlu0 %383 }
 0x170   : > { %v346_v54 = vadd.f32 %v2297_v10, %v332_v20  ;;  %v818_v20 = vmul.f32 %v816_v50, %v2444_v13 }
 0x172   : > { %v360_v55 = vadd.f32 %v356_v41, %v346_v54  ;;  %v859_v41 = vmul.f32 %v858_v3, %v2422_v52 }
 0x173   : > { %821 = vrot.lane.b32.xlu1 %v817_v57, %s1992_s17  ;;  %765 = vrot.lane.b32.xlu2 %v760_v59, %s1996_s3 }
 0x174   : > { %v374_v10 = vadd.f32 %v2333_v29, %v360_v55  ;;  %835 = vrot.lane.b32.xlu0 %v831_v62, %s1992_s17  ;;  %v832_v29 = vmul.f32 %v830_v53, %v2440_v6  ;;  %v874_v62 = vmul.f32 %v872_v34, %v2444_v13 }
 0x175   : > { %v354_v0 = vpop.permute.xlu1 %353  ;;  %v382_v1 = vpop.permute.xlu2 %381 }
 0x176   : > { %v388_v2 = vadd.f32 %v384_v43, %v374_v10  ;;  %v359_v4 = vadd.f32 %v354_v0, %v345_v63  ;;  %v410_v5 = vpop.permute.xlu0 %409  ;;  %v444_v43 = vmul.f32 %v442_v27, %v2183_v12  ;;  %v886_v63 = vstv %s2469_s7  ;;  %s2563_s7 = sld [smem:[#allocation7 + $0x9e]] }
 0x177   : > { %v845_v10 = vmul.f32 %v844_v15, %v2419_v49  ;;  %v900_v15 = vstv %s2476_s8  ;;  %s2567_s8 = sld [smem:[#allocation7 + $0x1f]] }
 0x178   : > { %v373_v60 = vadd.f32 %v2316_v21, %v359_v4  ;;  %v402_v24 = vadd.f32 %v2279_v47, %v388_v2  ;;  %v434_v21 = vstv %s2438_s26  ;;  %v888_v2 = vmul.f32 %v886_v63, %v2440_v6  ;;  %s2536_s26 = sld [smem:[#allocation7 + $0x1d]] }
 0x179   : > { %v435_v35 = vmul.f32 %v434_v21, %v2248_v48  ;;  %v436_v39 = vmul.f32 %v434_v21, %v2239_v42  ;;  %v873_v48 = vmul.f32 %v872_v34, %v2419_v49 }
 0x17a   : > { %v387_v17 = vadd.f32 %v382_v1, %v373_v60 }
 0x17b   : > { %837 = vrot.lane.b32.xlu1 %v832_v29, %s1992_s17  ;;  %791 = vrot.lane.b32.xlu2 %v787_v16, %s1997_s6 }
 0x17c   : > { %v401_v61 = vadd.f32 %v2348_v37, %v387_v17  ;;  %851 = vrot.lane.b32.xlu0 %v846_v18, %s1993_s24  ;;  %v443_v37 = vmul.f32 %v442_v27, %v2177_v7  ;;  %v914_v17 = vstv %s2478_s20  ;;  %s2578_s20 = sld [smem:[#allocation7 + $0x9f]] }
 0x17d   : > { %v412_v9 = vpop.permute.xlu1 %411  ;;  %v456_v26 = vpop.permute.xlu2 %455 }
 0x17e   : > { %v415_v31 = vadd.f32 %v410_v5, %v401_v61  ;;  %v416_v32 = vadd.f32 %v412_v9, %v402_v24  ;;  %v484_v33 = vpop.permute.xlu0 %483  ;;  %v901_v24 = vmul.f32 %v900_v15, %v2419_v49  ;;  %v860_v61 = vmul.f32 %v858_v3, %v2440_v6 }
 0x17f   : > { %v887_v3 = vmul.f32 %v886_v63, %v2422_v52 }
 0x180   : > { %v429_v40 = vadd.f32 %v2293_v8, %v415_v31  ;;  %v430_v47 = vadd.f32 %v2335_v30, %v416_v32 }
 0x182   : > { %v437_v53 = vadd.f32 %v435_v35, %v429_v40  ;;  %v438_v54 = vadd.f32 %v436_v39, %v430_v47 }
 0x183   : > { %863 = vrot.lane.b32.xlu1 %v859_v41, %s1993_s24  ;;  %823 = vrot.lane.b32.xlu2 %v818_v20, %s1992_s17  ;;  %v626_v41 = vstv %s2504_s28  ;;  %s2589_s28 = sld [smem:[#allocation7 + $0xa0]] }
 0x184   : > { %v445_v42 = vadd.f32 %v443_v37, %v437_v53  ;;  %v446_v8 = vadd.f32 %v444_v43, %v438_v54  ;;  %877 = vrot.lane.b32.xlu0 %v873_v48, %s1994_s25  ;;  %v942_v54 = vstv %s2506_s16  ;;  %v956_v48 = vstv %s2508_s5  ;;  %s2601_s16 = sld [smem:[#allocation7 + $0x95]] }
 0x185   : > { %v454_v7 = vpop.permute.xlu1 %453  ;;  %v482_v30 = vpop.permute.xlu2 %481  ;;  %s2605_s5 = sld [smem:[#allocation7 + $0x21]] }
 0x186   : > { %v460_v50 = vadd.f32 %v456_v26, %v446_v8  ;;  %v459_v57 = vadd.f32 %v454_v7, %v445_v42  ;;  %v510_v59 = vpop.permute.xlu0 %509 }
 0x188   : > { %v474_v12 = vadd.f32 %v2363_v45, %v460_v50  ;;  %v473_v55 = vadd.f32 %v2350_v38, %v459_v57  ;;  %v902_v50 = vmul.f32 %v900_v15, %v2444_v13  ;;  %v1000_v15 = vstv %s2536_s26  ;;  %s2614_s26 = sld [smem:[#allocation7 + $0x22]] }
 0x18a   : > { %v488_v0 = vadd.f32 %v484_v33, %v474_v12  ;;  %v487_v1 = vadd.f32 %v482_v30, %v473_v55  ;;  %v943_v30 = vmul.f32 %v942_v54, %v2422_v52 }
 0x18b   : > { %879 = vrot.lane.b32.xlu1 %v874_v62, %s1994_s25  ;;  %849 = vrot.lane.b32.xlu2 %v845_v10, %s1993_s24 }
 0x18c   : > { %v502_v4 = vadd.f32 %v2312_v19, %v488_v0  ;;  %v501_v45 = vadd.f32 %v2376_v56, %v487_v1  ;;  %893 = vrot.lane.b32.xlu0 %v888_v2, %s1994_s25  ;;  %v915_v56 = vmul.f32 %v914_v17, %v2422_v52  ;;  %v958_v0 = vmul.f32 %v956_v48, %v2444_v13 }
 0x18d   : > { %v512_v38 = vpop.permute.xlu1 %511  ;;  %v540_v5 = vpop.permute.xlu2 %539  ;;  %v970_v1 = vstv %s2529_s19  ;;  %s2611_s19 = sld [smem:[#allocation7 + $0xa1]] }
 0x18e   : > { %v515_v60 = vadd.f32 %v510_v59, %v501_v45  ;;  %v516_v29 = vadd.f32 %v512_v38, %v502_v4  ;;  %v568_v16 = vpop.permute.xlu0 %567  ;;  %v628_v59 = vmul.f32 %v626_v41, %v2318_v22  ;;  %v972_v45 = vmul.f32 %v970_v1, %v2440_v6 }
 0x190   : > { %v530_v18 = vadd.f32 %v2365_v46, %v516_v29  ;;  %v529_v21 = vadd.f32 %v2331_v28, %v515_v60  ;;  %v916_v28 = vmul.f32 %v914_v17, %v2440_v6  ;;  %v2550_v17 = vld [vmem:[#allocation2 + $0x1c] sm:$0xff] }
 0x192   : > { %v544_v19 = vadd.f32 %v540_v5, %v530_v18  ;;  %v1014_v18 = vstv %s2538_s29  ;;  %s2628_s29 = sld [smem:[#allocation7 + $0xa2]] }
 0x193   : > { %905 = vrot.lane.b32.xlu1 %v901_v24, %s1995_s30  ;;  %865 = vrot.lane.b32.xlu2 %v860_v61, %s1993_s24 }
 0x194   : > { %v558_v9 = vadd.f32 %v2390_v51, %v544_v19  ;;  %919 = vrot.lane.b32.xlu0 %v915_v56, %s1995_s30  ;;  %v928_v51 = vstv %s2496_s23  ;;  %v944_v19 = vmul.f32 %v942_v54, %v2440_v6  ;;  %s2586_s23 = sld [smem:[#allocation7 + $0x20]] }
 0x195   : > { %v538_v46 = vpop.permute.xlu1 %537  ;;  %v566_v26 = vpop.permute.xlu2 %565  ;;  %v930_v35 = vmul.f32 %v928_v51, %v2444_v13  ;;  %v929_v2 = vmul.f32 %v928_v51, %v2419_v49  ;;  %v1028_v51 = vstv %s2555_s27  ;;  %s2638_s27 = sld [smem:[#allocation7 + $0x24]] }
 0x196   : > { %v572_v27 = vadd.f32 %v568_v16, %v558_v9  ;;  %v543_v31 = vadd.f32 %v538_v46, %v529_v21  ;;  %v594_v32 = vpop.permute.xlu0 %593  ;;  %v2547_v16 = vld [vmem:[#allocation2 + $0x4] sm:$0xff]  ;;  %v1015_v21 = vmul.f32 %v1014_v18, %v2550_v17 }
 0x197   : > { %v1001_v61 = vmul.f32 %v1000_v15, %v2547_v16 }
 0x198   : > { %v557_v33 = vadd.f32 %v2379_v58, %v543_v31  ;;  %v586_v39 = vadd.f32 %v2346_v36, %v572_v27  ;;  %v618_v58 = vstv %s1714_s14  ;;  %v2561_v31 = vld [vmem:[#allocation2 + $0x24] sm:$0xff]  ;;  %s2599_s14 = sld [smem:[#allocation7 + $0x15]] }
 0x199   : > { %v619_v42 = vmul.f32 %v618_v58, %v2299_v11  ;;  %v620_v7 = vmul.f32 %v618_v58, %v2322_v23  ;;  %v957_v11 = vmul.f32 %v956_v48, %v2419_v49 }
 0x19a   : > { %v571_v34 = vadd.f32 %v566_v26, %v557_v33 }
 0x19b   : > { %921 = vrot.lane.b32.xlu1 %v916_v28, %s1995_s30  ;;  %891 = vrot.lane.b32.xlu2 %v887_v3, %s1994_s25  ;;  %v1016_v28 = vmul.f32 %v1014_v18, %v2561_v31  ;;  %v971_v3 = vmul.f32 %v970_v1, %v2422_v52  ;;  %v1112_v18 = vstv %s2605_s5  ;;  %s2701_s5 = sld [smem:[#allocation7 + $0x1c]] }
 0x19c   : > { %v585_v40 = vadd.f32 %v2404_v25, %v571_v34  ;;  %935 = vrot.lane.b32.xlu0 %v930_v35, %s1996_s3  ;;  %v627_v25 = vmul.f32 %v626_v41, %v2302_v14  ;;  %v1056_v41 = vstv %s2567_s8  ;;  %s2657_s8 = sld [smem:[#allocation7 + $0x25]] }
 0x19d   : > { %v596_v47 = vpop.permute.xlu1 %595  ;;  %v640_v37 = vpop.permute.xlu2 %639  ;;  %v1057_v48 = vmul.f32 %v1056_v41, %v2547_v16 }
 0x19e   : > { %v599_v20 = vadd.f32 %v594_v32, %v585_v40  ;;  %v600_v43 = vadd.f32 %v596_v47, %v586_v39  ;;  %v610_v53 = vpop.permute.xlu0 %609  ;;  %v2565_v32 = vld [vmem:[#allocation2 + $0xc] sm:$0xff] }
 0x19f   : > { %v1030_v35 = vmul.f32 %v1028_v51, %v2565_v32 }
 0x1a0   : > { %v613_v8 = vadd.f32 %v2361_v44, %v599_v20  ;;  %v614_v36 = vadd.f32 %v610_v53, %v600_v43  ;;  %v1002_v53 = vmul.f32 %v1000_v15, %v2565_v32 }
 0x1a2   : > { %v621_v57 = vadd.f32 %v619_v42, %v613_v8  ;;  %v622_v12 = vadd.f32 %v620_v7, %v614_v36 }
 0x1a3   : > { %947 = vrot.lane.b32.xlu1 %v943_v30, %s1996_s3  ;;  %907 = vrot.lane.b32.xlu2 %v902_v50, %s1995_s30  ;;  %v1058_v50 = vmul.f32 %v1056_v41, %v2565_v32 }
 0x1a4   : > { %v629_v23 = vadd.f32 %v627_v25, %v621_v57  ;;  %v630_v44 = vadd.f32 %v628_v59, %v622_v12  ;;  %961 = vrot.lane.b32.xlu0 %v957_v11, %s1997_s6  ;;  %v1070_v25 = vstv %s2578_s20  ;;  %v1029_v57 = vmul.f32 %v1028_v51, %v2547_v16  ;;  %s2665_s20 = sld [smem:[#allocation7 + $0xa5]] }
 0x1a5   : > { %v638_v14 = vpop.permute.xlu1 %637  ;;  %v666_v55 = vpop.permute.xlu2 %665  ;;  %v1072_v12 = vmul.f32 %v1070_v25, %v2561_v31  ;;  %v1126_v51 = vstv %s2611_s19  ;;  %s2703_s19 = sld [smem:[#allocation7 + $0x9c]] }
 0x1a6   : > { %v644_v62 = vadd.f32 %v640_v37, %v630_v44  ;;  %v643_v63 = vadd.f32 %v638_v14, %v629_v23  ;;  %v652_v10 = vpop.permute.xlu0 %651  ;;  %v1042_v37 = vstv %s2563_s7  ;;  %s2641_s7 = sld [smem:[#allocation7 + $0xa4]] }
 0x1a7   : > { %v1043_v43 = vmul.f32 %v1042_v37, %v2550_v17 }
 0x1a8   : > { %v657_v22 = vadd.f32 %v652_v10, %v643_v63 }
 0x1aa   : > { %v671_v4 = vadd.f32 %v666_v55, %v657_v22  ;;  %v1084_v55 = vstv %s2586_s23  ;;  %v1044_v22 = vmul.f32 %v1042_v37, %v2561_v31  ;;  %s2669_s23 = sld [smem:[#allocation7 + $0x26]] }
 0x1ab   : > { %963 = vrot.lane.b32.xlu1 %v958_v0, %s1997_s6  ;;  %933 = vrot.lane.b32.xlu2 %v929_v2, %s1996_s3  ;;  %v1085_v10 = vmul.f32 %v1084_v55, %v2547_v16 }
 0x1ac   : > { %977 = vrot.lane.b32.xlu0 %v972_v45, %s1997_s6 }
 0x1ad   : > { %v654_v38 = vpop.permute.xlu1 %653  ;;  %v682_v5 = vpop.permute.xlu2 %681 }
 0x1ae   : > { %v658_v60 = vadd.f32 %v654_v38, %v644_v62  ;;  %v668_v29 = vpop.permute.xlu0 %667  ;;  %v1098_v62 = vstv %s2589_s28  ;;  %s2680_s28 = sld [smem:[#allocation7 + $0xa6]] }
 0x1af   : > { %v1099_v1 = vmul.f32 %v1098_v62, %v2550_v17  ;;  %v1100_v15 = vmul.f32 %v1098_v62, %v2561_v31 }
 0x1b0   : > { %v672_v24 = vadd.f32 %v668_v29, %v658_v60  ;;  %v810_v29 = vstv %s2601_s16  ;;  %s2691_s16 = sld [smem:[#allocation7 + $0xa7]] }
 0x1b2   : > { %v686_v56 = vadd.f32 %v682_v5, %v672_v24  ;;  %v802_v5 = vstv %s2599_s14  ;;  %v1071_v24 = vmul.f32 %v1070_v25, %v2550_v17  ;;  %s2688_s14 = sld [smem:[#allocation7 + $0x27]] }
 0x1b3   : > { %1005 = vrot.lane.b32.xlu1 %v1001_v61, %s1992_s17  ;;  %949 = vrot.lane.b32.xlu2 %v944_v19, %s1996_s3  ;;  %v803_v61 = vmul.f32 %v802_v5, %v2419_v49  ;;  %v804_v49 = vmul.f32 %v802_v5, %v2444_v13 }
 0x1b4   : > { %1019 = vrot.lane.b32.xlu0 %v1015_v21, %s1992_s17  ;;  %v811_v21 = vmul.f32 %v810_v29, %v2422_v52  ;;  %v1086_v52 = vmul.f32 %v1084_v55, %v2565_v32 }
 0x1b5   : > { %v680_v9 = vpop.permute.xlu1 %679  ;;  %v708_v46 = vpop.permute.xlu2 %707 }
 0x1b6   : > { %v685_v26 = vadd.f32 %v680_v9, %v671_v4  ;;  %v694_v27 = vpop.permute.xlu0 %693 }
 0x1b8   : > { %v699_v33 = vadd.f32 %v694_v27, %v685_v26 }
 0x1ba   : > { %v713_v34 = vadd.f32 %v708_v46, %v699_v33 }
 0x1bb   : > { %1021 = vrot.lane.b32.xlu1 %v1016_v28, %s1992_s17  ;;  %975 = vrot.lane.b32.xlu2 %v971_v3, %s1997_s6  ;;  %v1140_v3 = vstv %s2614_s26  ;;  %s2707_s26 = sld [smem:[#allocation7 + $0x28]] }
 0x1bc   : > { %1035 = vrot.lane.b32.xlu0 %v1030_v35, %s1993_s24  ;;  %v1127_v35 = vmul.f32 %v1126_v51, %v2550_v17 }
 0x1bd   : > { %v696_v39 = vpop.permute.xlu1 %695  ;;  %v724_v40 = vpop.permute.xlu2 %723 }
 0x1be   : > { %v700_v58 = vadd.f32 %v696_v39, %v686_v56  ;;  %v710_v47 = vpop.permute.xlu0 %709  ;;  %v1114_v56 = vmul.f32 %v1112_v18, %v2565_v32  ;;  %v812_v39 = vmul.f32 %v810_v29, %v2440_v6 }
 0x1c0   : > { %v714_v20 = vadd.f32 %v710_v47, %v700_v58  ;;  %v1141_v58 = vmul.f32 %v1140_v3, %v2547_v16 }
 0x1c2   : > { %v728_v54 = vadd.f32 %v724_v40, %v714_v20 }
 0x1c3   : > { %1047 = vrot.lane.b32.xlu1 %v1043_v43, %s1993_s24  ;;  %1007 = vrot.lane.b32.xlu2 %v1002_v53, %s1992_s17  ;;  %v1154_v53 = vstv %s2628_s29  ;;  %s2713_s29 = sld [smem:[#allocation7 + $0xa8]] }
 0x1c4   : > { %1061 = vrot.lane.b32.xlu0 %v1057_v48, %s1994_s25  ;;  %v1113_v48 = vmul.f32 %v1112_v18, %v2547_v16 }
 0x1c5   : > { %v722_v42 = vpop.permute.xlu1 %721  ;;  %v750_v8 = vpop.permute.xlu2 %749 }
 0x1c6   : > { %v727_v7 = vadd.f32 %v722_v42, %v713_v34  ;;  %v736_v36 = vpop.permute.xlu0 %735 }
 0x1c8   : > { %v741_v30 = vadd.f32 %v736_v36, %v727_v7 }
 0x1ca   : > { %v755_v59 = vadd.f32 %v750_v8, %v741_v30  ;;  %v1156_v8 = vmul.f32 %v1154_v53, %v2561_v31 }
 0x1cb   : > { %1063 = vrot.lane.b32.xlu1 %v1058_v50, %s1994_s25  ;;  %1033 = vrot.lane.b32.xlu2 %v1029_v57, %s1993_s24  ;;  %v2649_v50 = vld [vmem:[#allocation2 + $0x5] sm:$0xff]  ;;  %v1184_v57 = vstv %s2638_s27  ;;  %s2716_s27 = sld [smem:[#allocation7 + $0x29]] }
 0x1cc   : > { %1077 = vrot.lane.b32.xlu0 %v1072_v12, %s1994_s25  ;;  %v1198_v12 = vstv %s2641_s7  ;;  %s2730_s7 = sld [smem:[#allocation7 + $0xa9]] }
 0x1cd   : > { %v738_v11 = vpop.permute.xlu1 %737  ;;  %v766_v23 = vpop.permute.xlu2 %765 }
 0x1ce   : > { %v742_v44 = vadd.f32 %v738_v11, %v728_v54  ;;  %v752_v14 = vpop.permute.xlu0 %751  ;;  %v1142_v54 = vmul.f32 %v1140_v3, %v2565_v32  ;;  %v1254_v3 = vstv %s2680_s28  ;;  %s2767_s28 = sld [smem:[#allocation7 + $0xac]] }
 0x1d0   : > { %v756_v63 = vadd.f32 %v752_v14, %v742_v44  ;;  %v1128_v44 = vmul.f32 %v1126_v51, %v2561_v31 }
 0x1d2   : > { %v770_v0 = vadd.f32 %v766_v23, %v756_v63  ;;  %v1185_v23 = vmul.f32 %v1184_v57, %v2649_v50 }
 0x1d3   : > { %1089 = vrot.lane.b32.xlu1 %v1085_v10, %s1995_s30  ;;  %1049 = vrot.lane.b32.xlu2 %v1044_v22, %s1993_s24 }
 0x1d4   : > { %1103 = vrot.lane.b32.xlu0 %v1099_v1, %s1995_s30  ;;  %v2667_v1 = vld [vmem:[#allocation2 + $0xd] sm:$0xff] }
 0x1d5   : > { %v764_v2 = vpop.permute.xlu1 %763  ;;  %v792_v4 = vpop.permute.xlu2 %791 }
 0x1d6   : > { %v769_v45 = vadd.f32 %v764_v2, %v755_v59  ;;  %v778_v38 = vpop.permute.xlu0 %777  ;;  %v2652_v59 = vld [vmem:[#allocation2 + $0x1d] sm:$0xff] }
 0x1d7   : > { %v1199_v55 = vmul.f32 %v1198_v12, %v2652_v59 }
 0x1d8   : > { %v783_v60 = vadd.f32 %v778_v38, %v769_v45  ;;  %v1212_v45 = vstv %s2657_s8  ;;  %v1155_v38 = vmul.f32 %v1154_v53, %v2550_v17  ;;  %s2740_s8 = sld [smem:[#allocation7 + $0x2b]] }
 0x1d9   : > { %v1214_v5 = vmul.f32 %v1212_v45, %v2667_v1 }
 0x1da   : > { %v797_v19 = vadd.f32 %v792_v4, %v783_v60 }
 0x1db   : > { %1105 = vrot.lane.b32.xlu1 %v1100_v15, %s1995_s30  ;;  %1075 = vrot.lane.b32.xlu2 %v1071_v24, %s1994_s25 }
 0x1dc   : > { %v805_v9 = vadd.f32 %v803_v61, %v797_v19  ;;  %1119 = vrot.lane.b32.xlu0 %v1114_v56, %s1996_s3  ;;  %v1226_v61 = vstv %s2665_s20  ;;  %v1240_v19 = vstv %s2669_s23  ;;  %s2743_s20 = sld [smem:[#allocation7 + $0xab]] }
 0x1dd   : > { %v780_v46 = vpop.permute.xlu1 %779  ;;  %v824_v26 = vpop.permute.xlu2 %823  ;;  %s2759_s23 = sld [smem:[#allocation7 + $0x2c]] }
 0x1de   : > { %v813_v27 = vadd.f32 %v811_v21, %v805_v9  ;;  %v784_v33 = vadd.f32 %v780_v46, %v770_v0  ;;  %v794_v28 = vpop.permute.xlu0 %793  ;;  %v2663_v0 = vld [vmem:[#allocation2 + $0x25] sm:$0xff]  ;;  %v1227_v21 = vmul.f32 %v1226_v61, %v2652_v59  ;;  %v1186_v9 = vmul.f32 %v1184_v57, %v2667_v1 }
 0x1df   : > { %v1200_v4 = vmul.f32 %v1198_v12, %v2663_v0  ;;  %v1241_v46 = vmul.f32 %v1240_v19, %v2649_v50  ;;  %v1228_v53 = vmul.f32 %v1226_v61, %v2663_v0  ;;  %v1296_v57 = vstv %s2707_s26  ;;  %s2805_s26 = sld [smem:[#allocation7 + $0x2f]] }
 0x1e0   : > { %v798_v34 = vadd.f32 %v794_v28, %v784_v33  ;;  %v1255_v12 = vmul.f32 %v1254_v3, %v2652_v59 }
 0x1e2   : > { %v806_v40 = vadd.f32 %v804_v49, %v798_v34  ;;  %v1242_v34 = vmul.f32 %v1240_v19, %v2667_v1 }
 0x1e3   : > { %1131 = vrot.lane.b32.xlu1 %v1127_v35, %s1996_s3  ;;  %1091 = vrot.lane.b32.xlu2 %v1086_v52, %s1995_s30  ;;  %v1213_v35 = vmul.f32 %v1212_v45, %v2649_v50  ;;  %v1256_v52 = vmul.f32 %v1254_v3, %v2663_v0 }
 0x1e4   : > { %v814_v47 = vadd.f32 %v812_v39, %v806_v40  ;;  %1145 = vrot.lane.b32.xlu0 %v1141_v58, %s1997_s6 }
 0x1e5   : > { %v822_v37 = vpop.permute.xlu1 %821  ;;  %v850_v13 = vpop.permute.xlu2 %849 }
 0x1e6   : > { %v828_v41 = vadd.f32 %v824_v26, %v814_v47  ;;  %v827_v20 = vadd.f32 %v822_v37, %v813_v27  ;;  %v836_v43 = vpop.permute.xlu0 %835 }
 0x1e8   : > { %v841_v6 = vadd.f32 %v836_v43, %v827_v20 }
 0x1ea   : > { %v855_v42 = vadd.f32 %v850_v13, %v841_v6  ;;  %v1268_v13 = vstv %s2688_s14  ;;  %s2771_s14 = sld [smem:[#allocation7 + $0x2d]] }
 0x1eb   : > { %1147 = vrot.lane.b32.xlu1 %v1142_v54, %s1997_s6  ;;  %1117 = vrot.lane.b32.xlu2 %v1113_v48, %s1996_s3  ;;  %v1269_v43 = vmul.f32 %v1268_v13, %v2649_v50 }
 0x1ec   : > { %1161 = vrot.lane.b32.xlu0 %v1156_v8, %s1997_s6 }
 0x1ed   : > { %v838_v7 = vpop.permute.xlu1 %837  ;;  %v866_v36 = vpop.permute.xlu2 %865 }
 0x1ee   : > { %v842_v25 = vadd.f32 %v838_v7, %v828_v41  ;;  %v852_v30 = vpop.permute.xlu0 %851  ;;  %v1282_v41 = vstv %s2691_s16  ;;  %s2782_s16 = sld [smem:[#allocation7 + $0xad]] }
 0x1ef   : > { %v1283_v6 = vmul.f32 %v1282_v41, %v2652_v59 }
 0x1f0   : > { %v856_v11 = vadd.f32 %v852_v30, %v842_v25  ;;  %v1284_v30 = vmul.f32 %v1282_v41, %v2663_v0 }
 0x1f2   : > { %v870_v14 = vadd.f32 %v866_v36, %v856_v11  ;;  %v986_v36 = vstv %s2701_s5  ;;  %v994_v11 = vstv %s2703_s19  ;;  %s2790_s5 = sld [smem:[#allocation7 + $0x2e]] }
 0x1f3   : > { %1189 = vrot.lane.b32.xlu1 %v1185_v23, %s1992_s17  ;;  %1133 = vrot.lane.b32.xlu2 %v1128_v44, %s1996_s3  ;;  %v1298_v44 = vmul.f32 %v1296_v57, %v2667_v1  ;;  %s2793_s19 = sld [smem:[#allocation7 + $0xae]] }
 0x1f4   : > { %1203 = vrot.lane.b32.xlu0 %v1199_v55, %s1992_s17  ;;  %v995_v55 = vmul.f32 %v994_v11, %v2550_v17 }
 0x1f5   : > { %v864_v62 = vpop.permute.xlu1 %863  ;;  %v892_v63 = vpop.permute.xlu2 %891 }
 0x1f6   : > { %v869_v10 = vadd.f32 %v864_v62, %v855_v42  ;;  %v878_v22 = vpop.permute.xlu0 %877 }
 0x1f8   : > { %v883_v2 = vadd.f32 %v878_v22, %v869_v10 }
 0x1fa   : > { %v897_v60 = vadd.f32 %v892_v63, %v883_v2 }
 0x1fb   : > { %1205 = vrot.lane.b32.xlu1 %v1200_v4, %s1992_s17  ;;  %1159 = vrot.lane.b32.xlu2 %v1155_v38, %s1997_s6  ;;  %v1310_v4 = vstv %s2713_s29  ;;  %v1324_v38 = vstv %s2716_s27  ;;  %s2809_s29 = sld [smem:[#allocation7 + $0xa3]] }
 0x1fc   : > { %1219 = vrot.lane.b32.xlu0 %v1214_v5, %s1993_s24  ;;  %v1325_v17 = vmul.f32 %v1324_v38, %v2649_v50  ;;  %s2815_s27 = sld [smem:[#allocation7 + $0xaf]] }
 0x1fd   : > { %v880_v29 = vpop.permute.xlu1 %879  ;;  %v908_v15 = vpop.permute.xlu2 %907 }
 0x1fe   : > { %v884_v18 = vadd.f32 %v880_v29, %v870_v14  ;;  %v894_v24 = vpop.permute.xlu0 %893  ;;  %v987_v14 = vmul.f32 %v986_v36, %v2547_v16  ;;  %v988_v16 = vmul.f32 %v986_v36, %v2565_v32  ;;  %v1270_v29 = vmul.f32 %v1268_v13, %v2667_v1 }
 0x200   : > { %v898_v56 = vadd.f32 %v894_v24, %v884_v18  ;;  %v996_v18 = vmul.f32 %v994_v11, %v2561_v31 }
 0x202   : > { %v912_v26 = vadd.f32 %v908_v15, %v898_v56 }
 0x203   : > { %1231 = vrot.lane.b32.xlu1 %v1227_v21, %s1993_s24  ;;  %1191 = vrot.lane.b32.xlu2 %v1186_v9, %s1992_s17  ;;  %v1338_v9 = vstv %s2730_s7  ;;  %s2818_s7 = sld [smem:[#allocation7 + $0x30]] }
 0x204   : > { %1245 = vrot.lane.b32.xlu0 %v1241_v46, %s1994_s25  ;;  %v1326_v46 = vmul.f32 %v1324_v38, %v2667_v1  ;;  %v1438_v38 = vstv %s2782_s16  ;;  %s1576_s16 = scalar_lea.sflag [#allocation5], %s2112_s4 }
 0x205   : > { %v906_v27 = vpop.permute.xlu1 %905  ;;  %v934_v33 = vpop.permute.xlu2 %933 }
 0x206   : > { %v911_v28 = vadd.f32 %v906_v27, %v897_v60  ;;  %v920_v51 = vpop.permute.xlu0 %919  ;;  %v1311_v60 = vmul.f32 %v1310_v4, %v2652_v59  ;;  %v1340_v27 = vmul.f32 %v1338_v9, %v2663_v0 }
 0x208   : > { %v925_v49 = vadd.f32 %v920_v51, %v911_v28 }
 0x20a   : > { %v939_v39 = vadd.f32 %v934_v33, %v925_v49 }
 0x20b   : > { %1247 = vrot.lane.b32.xlu1 %v1242_v34, %s1994_s25  ;;  %1217 = vrot.lane.b32.xlu2 %v1213_v35, %s1993_s24  ;;  %v2751_v34 = vld [vmem:[#allocation2 + $0x6] sm:$0xff]  ;;  %v1368_v35 = vstv %s2740_s8 }
 0x20c   : > { %1261 = vrot.lane.b32.xlu0 %v1256_v52, %s1994_s25  ;;  %v2754_v52 = vld [vmem:[#allocation2 + $0x1e] sm:$0xff] }
 0x20d   : > { %v922_v40 = vpop.permute.xlu1 %921  ;;  %v950_v58 = vpop.permute.xlu2 %949 }
 0x20e   : > { %v926_v47 = vadd.f32 %v922_v40, %v912_v26  ;;  %v936_v37 = vpop.permute.xlu0 %935  ;;  %v1297_v26 = vmul.f32 %v1296_v57, %v2649_v50 }
 0x210   : > { %v940_v20 = vadd.f32 %v936_v37, %v926_v47  ;;  %v1312_v47 = vmul.f32 %v1310_v4, %v2663_v0 }
 0x212   : > { %v954_v54 = vadd.f32 %v950_v58, %v940_v20  ;;  %v1369_v58 = vmul.f32 %v1368_v35, %v2751_v34 }
 0x213   : > { %1273 = vrot.lane.b32.xlu1 %v1269_v43, %s1995_s30  ;;  %1233 = vrot.lane.b32.xlu2 %v1228_v53, %s1993_s24 }
 0x214   : > { %1287 = vrot.lane.b32.xlu0 %v1283_v6, %s1995_s30  ;;  %v2765_v6 = vld [vmem:[#allocation2 + $0x26] sm:$0xff] }
 0x215   : > { %v948_v48 = vpop.permute.xlu1 %947  ;;  %v976_v42 = vpop.permute.xlu2 %975 }
 0x216   : > { %v953_v8 = vadd.f32 %v948_v48, %v939_v39  ;;  %v962_v7 = vpop.permute.xlu0 %961  ;;  %v1382_v39 = vstv %s2743_s20 }
 0x217   : > { %v1383_v37 = vmul.f32 %v1382_v39, %v2754_v52 }
 0x218   : > { %v967_v25 = vadd.f32 %v962_v7, %v953_v8  ;;  %v1339_v8 = vmul.f32 %v1338_v9, %v2652_v59  ;;  %v1396_v7 = vstv %s2759_s23 }
 0x21a   : > { %v981_v23 = vadd.f32 %v976_v42, %v967_v25  ;;  %v1384_v42 = vmul.f32 %v1382_v39, %v2765_v6  ;;  %v1480_v39 = vstv %s2805_s26 }
 0x21b   : > { %1289 = vrot.lane.b32.xlu1 %v1284_v30, %s1995_s30  ;;  %1259 = vrot.lane.b32.xlu2 %v1255_v12, %s1994_s25 }
 0x21c   : > { %1303 = vrot.lane.b32.xlu0 %v1298_v44, %s1996_s3  ;;  %v989_v62 = vadd.f32 %v987_v14, %v981_v23  ;;  %v1410_v23 = vstv %s2767_s28  ;;  %v1424_v44 = vstv %s2771_s14 }
 0x21d   : > { %v964_v63 = vpop.permute.xlu1 %963  ;;  %v1008_v10 = vpop.permute.xlu2 %1007  ;;  %v1412_v9 = vmul.f32 %v1410_v23, %v2765_v6 }
 0x21e   : > { %v968_v22 = vadd.f32 %v964_v63, %v954_v54  ;;  %v978_v2 = vpop.permute.xlu0 %977  ;;  %v997_v45 = vadd.f32 %v995_v55, %v989_v62  ;;  %v2769_v54 = vld [vmem:[#allocation2 + $0xe] sm:$0xff]  ;;  %v1411_v55 = vmul.f32 %v1410_v23, %v2754_v52  ;;  %v1425_v63 = vmul.f32 %v1424_v44, %v2751_v34 }
 0x21f   : > { %v1398_v36 = vmul.f32 %v1396_v7, %v2769_v54  ;;  %v1370_v62 = vmul.f32 %v1368_v35, %v2769_v54  ;;  %v1439_v35 = vmul.f32 %v1438_v38, %v2754_v52 }
 0x220   : > { %v982_v5 = vadd.f32 %v978_v2, %v968_v22 }
 0x222   : > { %v990_v15 = vadd.f32 %v988_v16, %v982_v5  ;;  %v1426_v5 = vmul.f32 %v1424_v44, %v2769_v54 }
 0x223   : > { %1315 = vrot.lane.b32.xlu1 %v1311_v60, %s1996_s3  ;;  %1275 = vrot.lane.b32.xlu2 %v1270_v29, %s1995_s30  ;;  %v1397_v60 = vmul.f32 %v1396_v7, %v2751_v34  ;;  %v1440_v29 = vmul.f32 %v1438_v38, %v2765_v6  ;;  %v1508_v7 = vstv %s2818_s7 }
 0x224   : > { %1329 = vrot.lane.b32.xlu0 %v1325_v17, %s1997_s6  ;;  %v998_v24 = vadd.f32 %v996_v18, %v990_v15 }
 0x225   : > { %v1006_v61 = vpop.permute.xlu1 %1005  ;;  %v1034_v32 = vpop.permute.xlu2 %1033 }
 0x226   : > { %v1011_v19 = vadd.f32 %v1006_v61, %v997_v45  ;;  %v1020_v56 = vpop.permute.xlu0 %1019  ;;  %v1012_v21 = vadd.f32 %v1008_v10, %v998_v24 }
 0x228   : > { %v1025_v31 = vadd.f32 %v1020_v56, %v1011_v19  ;;  %v1466_v19 = vstv %s2793_s19 }
 0x22a   : > { %v1039_v33 = vadd.f32 %v1034_v32, %v1025_v31  ;;  %v1452_v32 = vstv %s2790_s5  ;;  %v1467_v31 = vmul.f32 %v1466_v19, %v2754_v52 }
 0x22b   : > { %1331 = vrot.lane.b32.xlu1 %v1326_v46, %s1997_s6  ;;  %1301 = vrot.lane.b32.xlu2 %v1297_v26, %s1996_s3 }
 0x22c   : > { %1345 = vrot.lane.b32.xlu0 %v1340_v27, %s1997_s6 }
 0x22d   : > { %v1022_v28 = vpop.permute.xlu1 %1021  ;;  %v1050_v51 = vpop.permute.xlu2 %1049 }
 0x22e   : > { %v1026_v3 = vadd.f32 %v1022_v28, %v1012_v21  ;;  %v1036_v49 = vpop.permute.xlu0 %1035  ;;  %v1453_v21 = vmul.f32 %v1452_v32, %v2751_v34 }
 0x230   : > { %v1040_v40 = vadd.f32 %v1036_v49, %v1026_v3  ;;  %v1468_v49 = vmul.f32 %v1466_v19, %v2765_v6 }
 0x232   : > { %v1054_v13 = vadd.f32 %v1050_v51, %v1040_v40  ;;  %v1178_v40 = vstv %s2809_s29  ;;  %s1935_s29 = scalar_lea.hbm %s2895_s2, 32 }
 0x233   : > { %1373 = vrot.lane.b32.xlu1 %v1369_v58, %s1992_s17  ;;  %1317 = vrot.lane.b32.xlu2 %v1312_v47, %s1996_s3  ;;  %v1482_v47 = vmul.f32 %v1480_v39, %v2769_v54 }
 0x234   : > { %1387 = vrot.lane.b32.xlu0 %v1383_v37, %s1992_s17 }
 0x235   : > { %v1048_v41 = vpop.permute.xlu1 %1047  ;;  %v1076_v20 = vpop.permute.xlu2 %1075 }
 0x236   : > { %v1053_v43 = vadd.f32 %v1048_v41, %v1039_v33  ;;  %v1062_v53 = vpop.permute.xlu0 %1061 }
 0x238   : > { %v1067_v48 = vadd.f32 %v1062_v53, %v1053_v43 }
 0x23a   : > { %v1081_v25 = vadd.f32 %v1076_v20, %v1067_v48 }
 0x23b   : > { %1389 = vrot.lane.b32.xlu1 %v1384_v42, %s1992_s17  ;;  %1343 = vrot.lane.b32.xlu2 %v1339_v8, %s1997_s6  ;;  %v1494_v42 = vstv %s2815_s27 }
 0x23c   : > { %1403 = vrot.lane.b32.xlu0 %v1398_v36, %s1993_s24 }
 0x23d   : > { %v1064_v30 = vpop.permute.xlu1 %1063  ;;  %v1092_v57 = vpop.permute.xlu2 %1091 }
 0x23e   : > { %v1068_v12 = vadd.f32 %v1064_v30, %v1054_v13  ;;  %v1078_v11 = vpop.permute.xlu0 %1077  ;;  %v1179_v13 = vmul.f32 %v1178_v40, %v2652_v59  ;;  %v1454_v30 = vmul.f32 %v1452_v32, %v2769_v54  ;;  %v1509_v59 = vmul.f32 %v1508_v7, %v2751_v34 }
 0x240   : > { %v1082_v14 = vadd.f32 %v1078_v11, %v1068_v12  ;;  %v1180_v12 = vmul.f32 %v1178_v40, %v2663_v0 }
 0x242   : > { %v1096_v10 = vadd.f32 %v1092_v57, %v1082_v14 }
 0x243   : > { %1415 = vrot.lane.b32.xlu1 %v1411_v55, %s1993_s24  ;;  %1375 = vrot.lane.b32.xlu2 %v1370_v62, %s1992_s17  ;;  %s2803_s17 = sld [smem:[#allocation7 + $0x23]] }
 0x244   : > { %1429 = vrot.lane.b32.xlu0 %v1425_v63, %s1994_s25 }
 0x245   : > { %v1090_v22 = vpop.permute.xlu1 %1089  ;;  %v1118_v2 = vpop.permute.xlu2 %1117 }
 0x246   : > { %v1095_v4 = vadd.f32 %v1090_v22, %v1081_v25  ;;  %v1104_v45 = vpop.permute.xlu0 %1103  ;;  %v1495_v25 = vmul.f32 %v1494_v42, %v2754_v52  ;;  %v1481_v22 = vmul.f32 %v1480_v39, %v2751_v34 }
 0x248   : > { %v1109_v16 = vadd.f32 %v1104_v45, %v1095_v4 }
 0x249   : > { %v1170_v51 = vstv %s2803_s17 }
 0x24a   : > { %v1123_v15 = vadd.f32 %v1118_v2, %v1109_v16  ;;  %v1171_v37 = vmul.f32 %v1170_v51, %v2649_v50  ;;  %v1172_v50 = vmul.f32 %v1170_v51, %v2667_v1 }
 0x24b   : > { %1431 = vrot.lane.b32.xlu1 %v1426_v5, %s1994_s25  ;;  %1401 = vrot.lane.b32.xlu2 %v1397_v60, %s1993_s24  ;;  %v1496_v60 = vmul.f32 %v1494_v42, %v2765_v6 }
 0x24c   : > { %1445 = vrot.lane.b32.xlu0 %v1440_v29, %s1994_s25 }
 0x24d   : > { %v1106_v17 = vpop.permute.xlu1 %1105  ;;  %v1134_v18 = vpop.permute.xlu2 %1133 }
 0x24e   : > { %v1110_v24 = vadd.f32 %v1106_v17, %v1096_v10  ;;  %v1120_v61 = vpop.permute.xlu0 %1119  ;;  %v1510_v10 = vmul.f32 %v1508_v7, %v2769_v54 }
 0x250   : > { %v1124_v56 = vadd.f32 %v1120_v61, %v1110_v24 }
 0x252   : > { %v1138_v46 = vadd.f32 %v1134_v18, %v1124_v56 }
 0x253   : > { %1457 = vrot.lane.b32.xlu1 %v1453_v21, %s1995_s30  ;;  %1417 = vrot.lane.b32.xlu2 %v1412_v9, %s1993_s24  ;;  %s2832_s24 = sld [smem:[#allocation7 + $0xb0]] }
 0x254   : > { %1471 = vrot.lane.b32.xlu0 %v1467_v31, %s1995_s30 }
 0x255   : > { %v1132_v26 = vpop.permute.xlu1 %1131  ;;  %v1160_v27 = vpop.permute.xlu2 %1159 }
 0x256   : > { %v1137_v33 = vadd.f32 %v1132_v26, %v1123_v15  ;;  %v1146_v28 = vpop.permute.xlu0 %1145 }
 0x258   : > { %v1151_v3 = vadd.f32 %v1146_v28, %v1137_v33 }
 0x259   : > { %v1522_v62 = vstv %s2832_s24 }
 0x25a   : > { %v1165_v58 = vadd.f32 %v1160_v27, %v1151_v3  ;;  %v1524_v0 = vmul.f32 %v1522_v62, %v2765_v6  ;;  %v1523_v24 = vmul.f32 %v1522_v62, %v2754_v52 }
 0x25b   : > { %1473 = vrot.lane.b32.xlu1 %v1468_v49, %s1995_s30  ;;  %1443 = vrot.lane.b32.xlu2 %v1439_v35, %s1994_s25  ;;  %s1770_s25 = sld [smem:[#allocation7 + $0x2a]] }
 0x25c   : > { %1487 = vrot.lane.b32.xlu0 %v1482_v47, %s1996_s3  ;;  %v1173_v41 = vadd.f32 %v1171_v37, %v1165_v58 }
 0x25d   : > { %v1148_v20 = vpop.permute.xlu1 %1147  ;;  %v1192_v43 = vpop.permute.xlu2 %1191 }
 0x25e   : > { %v1152_v53 = vadd.f32 %v1148_v20, %v1138_v46  ;;  %v1162_v48 = vpop.permute.xlu0 %1161  ;;  %v1181_v8 = vadd.f32 %v1179_v13, %v1173_v41 }
 0x260   : > { %v1166_v36 = vadd.f32 %v1162_v48, %v1152_v53 }
 0x261   : > { %v1354_v20 = vstv %s1770_s25 }
 0x262   : > { %v1174_v57 = vadd.f32 %v1172_v50, %v1166_v36 }
 0x263   : > { %1499 = vrot.lane.b32.xlu1 %v1495_v25, %s1996_s3  ;;  %1459 = vrot.lane.b32.xlu2 %v1454_v30, %s1995_s30  ;;  %s1771_s30 = sld [smem:[#allocation7 + $0xaa]] }
 0x264   : > { %1513 = vrot.lane.b32.xlu0 %v1509_v59, %s1997_s6  ;;  %v1182_v11 = vadd.f32 %v1180_v12, %v1174_v57 }
 0x265   : > { %v1190_v23 = vpop.permute.xlu1 %1189  ;;  %v1218_v1 = vpop.permute.xlu2 %1217 }
 0x266   : > { %v1195_v44 = vadd.f32 %v1190_v23, %v1181_v8  ;;  %v1204_v14 = vpop.permute.xlu0 %1203  ;;  %v1196_v55 = vadd.f32 %v1192_v43, %v1182_v11  ;;  %v1355_v8 = vmul.f32 %v1354_v20, %v2751_v34  ;;  %v1356_v11 = vmul.f32 %v1354_v20, %v2769_v54 }
 0x268   : > { %v1209_v63 = vadd.f32 %v1204_v14, %v1195_v44 }
 0x269   : > { %v1362_v48 = vstv %s1771_s30 }
 0x26a   : > { %v1223_v2 = vadd.f32 %v1218_v1, %v1209_v63  ;;  %v1363_v50 = vmul.f32 %v1362_v48, %v2754_v52  ;;  %v1364_v44 = vmul.f32 %v1362_v48, %v2765_v6 }
 0x26b   : > { %1515 = vrot.lane.b32.xlu1 %v1510_v10, %s1997_s6  ;;  %1485 = vrot.lane.b32.xlu2 %v1481_v22, %s1996_s3 }
 0x26c   : > { %1529 = vrot.lane.b32.xlu0 %v1524_v0, %s1997_s6 }
 0x26d   : > { %v1206_v4 = vpop.permute.xlu1 %1205  ;;  %v1234_v45 = vpop.permute.xlu2 %1233 }
 0x26e   : > { %v1210_v38 = vadd.f32 %v1206_v4, %v1196_v55  ;;  %v1220_v16 = vpop.permute.xlu0 %1219 }
 0x270   : > { %v1224_v5 = vadd.f32 %v1220_v16, %v1210_v38 }
 0x272   : > { %v1238_v29 = vadd.f32 %v1234_v45, %v1224_v5 }
 0x273   : > { %1501 = vrot.lane.b32.xlu2 %v1496_v60, %s1996_s3  ;;  %s1686_s3 = sshll.u32 %s2112_s4, 4 }
 0x275   : > { %v1232_v15 = vpop.permute.xlu1 %1231  ;;  %v1260_v17 = vpop.permute.xlu2 %1259 }
 0x276   : > { %v1246_v18 = vpop.permute.xlu0 %1245  ;;  %v1237_v56 = vadd.f32 %v1232_v15, %v1223_v2 }
 0x278   : > { %v1251_v31 = vadd.f32 %v1246_v18, %v1237_v56 }
 0x27a   : > { %v1265_v27 = vadd.f32 %v1260_v17, %v1251_v31 }
 0x27b   : > { %1527 = vrot.lane.b32.xlu2 %v1523_v24, %s1997_s6  ;;  %s1792_s6 = sshll.u32 %s2036_s13, 4  ;;  %s177_s13 = scalar_lea.vmem [#allocation8], %s1686_s3 }
 0x27c   : > { %s1587_s23 = scalar_lea.hbm %s2895_s2, %s1792_s6  ;;  %s1588_s28 = sshll.u32 %s177_s13, 4  ;;  %s1589_s28 = int_to_ptr.vmem [resolvable:$true] %s1588_s28 }
 0x27d   : > { %v1248_v61 = vpop.permute.xlu1 %1247  ;;  %v1276_v32 = vpop.permute.xlu2 %1275  ;;  %s1590_s14 = sshll.u32 %s1587_s23, 4  ;;  %s1591_s14 = int_to_ptr.hbm [resolvable:$true] %s1590_s14 }
 0x27e   : > { %v1262_v19 = vpop.permute.xlu0 %1261  ;;  %v1252_v26 = vadd.f32 %v1248_v61, %v1238_v29  ;;  %s1929_s5 = sshra.s32 %s1591_s14, 4  ;;  %s1930_s5 = int_to_ptr.hbm [resolvable:$true] %s1929_s5 }
 0x27f   : > { %s1931_s19 = scalar_lea.hbm %s1930_s5, 16  ;;  %p1936_p0 = scmp.lt.s32.totalorder %s1930_s5, %s2895_s2 }
 0x280   : > { %v1266_v3 = vadd.f32 %v1262_v19, %v1252_v26  ;;  %p1932_p4 = scmp.ne.s32.totalorder %s1930_s5, %s1931_s19  ;;  %p1937_p3 = scmp.lt.s32.totalorder %s1935_s29, %s1931_s19 }
 0x282   : > { %v1280_v39 = vadd.f32 %v1276_v32, %v1266_v3  ;;  %p1933_p6 = pnand %p1932_p4, %p2067_p11  ;;  %p1938_p5 = por %p1937_p3, %p1936_p0 }
 0x284   : > { %p1934_p13 = pneg %p1933_p6 }
 0x285   : > { %v1274_v21 = vpop.permute.xlu1 %1273  ;;  %v1302_v9 = vpop.permute.xlu2 %1301 }
 0x286   : > { %v1288_v46 = vpop.permute.xlu0 %1287  ;;  %v1279_v33 = vadd.f32 %v1274_v21, %v1265_v27  ;;  %p1939_p8 = pnand %p1938_p5, %p1934_p13 }
 0x288   : > { %v1293_v35 = vadd.f32 %v1288_v46, %v1279_v33 }
 0x28a   : > { %v1307_v58 = vadd.f32 %v1302_v9, %v1293_v35 }
 0x28d   : > { %v1290_v28 = vpop.permute.xlu1 %1289  ;;  %v1318_v51 = vpop.permute.xlu2 %1317 }
 0x28e   : > { %v1304_v49 = vpop.permute.xlu0 %1303  ;;  %v1294_v40 = vadd.f32 %v1290_v28, %v1280_v39 }
 0x290   : > { %v1308_v43 = vadd.f32 %v1304_v49, %v1294_v40 }
 0x292   : > { %v1322_v7 = vadd.f32 %v1318_v51, %v1308_v43 }
 0x295   : > { %v1316_v47 = vpop.permute.xlu1 %1315  ;;  %v1344_v37 = vpop.permute.xlu2 %1343 }
 0x296   : > { %v1321_v13 = vadd.f32 %v1316_v47, %v1307_v58  ;;  %v1330_v41 = vpop.permute.xlu0 %1329 }
 0x298   : > { %v1335_v53 = vadd.f32 %v1330_v41, %v1321_v13 }
 0x29a   : > { %v1349_v42 = vadd.f32 %v1344_v37, %v1335_v53 }
 0x29c   : > { %v1357_v36 = vadd.f32 %v1355_v8, %v1349_v42 }
 0x29d   : > { %v1332_v25 = vpop.permute.xlu1 %1331  ;;  %v1376_v30 = vpop.permute.xlu2 %1375 }
 0x29e   : > { %v1336_v57 = vadd.f32 %v1332_v25, %v1322_v7  ;;  %v1346_v59 = vpop.permute.xlu0 %1345  ;;  %v1365_v12 = vadd.f32 %v1363_v50, %v1357_v36 }
 0x2a0   : > { %v1350_v23 = vadd.f32 %v1346_v59, %v1336_v57 }
 0x2a2   : > { %v1358_v1 = vadd.f32 %v1356_v11, %v1350_v23 }
 0x2a4   : > { %v1366_v14 = vadd.f32 %v1364_v44, %v1358_v1 }
 0x2a5   : > { %v1374_v55 = vpop.permute.xlu1 %1373  ;;  %v1402_v62 = vpop.permute.xlu2 %1401 }
 0x2a6   : > { %v1388_v63 = vpop.permute.xlu0 %1387  ;;  %v1379_v4 = vadd.f32 %v1374_v55, %v1365_v12  ;;  %v1380_v5 = vadd.f32 %v1376_v30, %v1366_v14 }
 0x2a8   : > { %v1393_v45 = vadd.f32 %v1388_v63, %v1379_v4 }
 0x2aa   : > { %v1407_v29 = vadd.f32 %v1402_v62, %v1393_v45 }
 0x2ad   : > { %v1390_v34 = vpop.permute.xlu1 %1389  ;;  %v1418_v10 = vpop.permute.xlu2 %1417 }
 0x2ae   : > { %v1404_v22 = vpop.permute.xlu0 %1403  ;;  %v1394_v60 = vadd.f32 %v1390_v34, %v1380_v5 }
 0x2b0   : > { %v1408_v6 = vadd.f32 %v1404_v22, %v1394_v60 }
 0x2b2   : > { %v1422_v32 = vadd.f32 %v1418_v10, %v1408_v6 }
 0x2b5   : > { %v1416_v52 = vpop.permute.xlu1 %1415  ;;  %v1444_v0 = vpop.permute.xlu2 %1443 }
 0x2b6   : > { %v1430_v2 = vpop.permute.xlu0 %1429  ;;  %v1421_v15 = vadd.f32 %v1416_v52, %v1407_v29 }
 0x2b8   : > { %v1435_v24 = vadd.f32 %v1430_v2, %v1421_v15 }
 0x2ba   : > { %v1449_v56 = vadd.f32 %v1444_v0, %v1435_v24 }
 0x2bd   : > { %v1432_v38 = vpop.permute.xlu1 %1431  ;;  %v1460_v16 = vpop.permute.xlu2 %1459 }
 0x2be   : > { %v1446_v54 = vpop.permute.xlu0 %1445  ;;  %v1436_v19 = vadd.f32 %v1432_v38, %v1422_v32 }
 0x2c0   : > { %v1450_v31 = vadd.f32 %v1446_v54, %v1436_v19 }
 0x2c2   : > { %v1464_v33 = vadd.f32 %v1460_v16, %v1450_v31 }
 0x2c5   : > { %v1458_v17 = vpop.permute.xlu1 %1457  ;;  %v1486_v18 = vpop.permute.xlu2 %1485 }
 0x2c6   : > { %v1472_v61 = vpop.permute.xlu0 %1471  ;;  %v1463_v21 = vadd.f32 %v1458_v17, %v1449_v56 }
 0x2c8   : > { %v1477_v27 = vadd.f32 %v1472_v61, %v1463_v21 }
 0x2ca   : > { %v1491_v51 = vadd.f32 %v1486_v18, %v1477_v27 }
 0x2cd   : > { %v1474_v9 = vpop.permute.xlu1 %1473  ;;  %v1502_v26 = vpop.permute.xlu2 %1501 }
 0x2ce   : > { %v1488_v46 = vpop.permute.xlu0 %1487  ;;  %v1478_v28 = vadd.f32 %v1474_v9, %v1464_v33 }
 0x2d0   : > { %v1492_v39 = vadd.f32 %v1488_v46, %v1478_v28 }
 0x2d2   : > { %v1506_v13 = vadd.f32 %v1502_v26, %v1492_v39 }
 0x2d5   : > { %v1500_v3 = vpop.permute.xlu1 %1499  ;;  %v1528_v58 = vpop.permute.xlu2 %1527 }
 0x2d6   : > { %v1505_v49 = vadd.f32 %v1500_v3, %v1491_v51  ;;  %v1514_v35 = vpop.permute.xlu0 %1513 }
 0x2d8   : > { %v1519_v40 = vadd.f32 %v1514_v35, %v1505_v49 }
 0x2da   : > { %v1533_v47 = vadd.f32 %v1528_v58, %v1519_v40 }
 0x2dc   : > { %v1784_v37 = vmul.f32 -1.442695, %v1533_v47 }
 0x2dd   : > { %v1516_v41 = vpop.permute.xlu1 %1515 }
 0x2de   : > { %1862 = vpow2.f32 %v1784_v37  ;;  %v1520_v20 = vadd.f32 %v1516_v41, %v1506_v13  ;;  %v1530_v43 = vpop.permute.xlu0 %1529 }
 0x2e0   : > { %v1534_v53 = vadd.f32 %v1530_v43, %v1520_v20 }
 0x2e2   : > { %v1785_v48 = vmul.f32 -1.442695, %v1534_v53 }
 0x2e4   : > { %v1863_v42 = vpop.eup %1862  ;;  %1864 = vpow2.f32 %v1785_v48 }
 0x2e5   : > { %v1541_v8 = vadd.f32 1.0, %v1863_v42 }
 0x2e7   : > { %1866 = vrcp.f32 %v1541_v8  ;;  %v1554_v57 = vand.u32 2147483648, %v1541_v8  ;;  %v1552_v12 = vand.u32 2147483647, %v1541_v8  ;;  %vm1548_vm5 = vweird.f32 %v1541_v8 }
 0x2e9   : > { %v1555_v44 = vor.u32 1.1754944e-38, %v1554_v57  ;;  %vm1553_vm7 = vcmp.eq.f32.partialorder %v1552_v12, 8.507059e+37 }
 0x2ea   : > { %v1865_v7 = vpop.eup %1864 }
 0x2eb   : > { %v1542_v50 = vadd.f32 1.0, %v1865_v7 }
 0x2ed   : > { %v1867_v36 = vpop.eup %1866  ;;  %1868 = vrcp.f32 %v1542_v50  ;;  %v1569_v62 = vand.u32 2147483648, %v1542_v50  ;;  %v1567_v10 = vand.u32 2147483647, %v1542_v50  ;;  %vm1563_vm9 = vweird.f32 %v1542_v50 }
 0x2ee   : > { %v1544_v25 = vmul.f32 %v1867_v36, %v1541_v8  ;;  %vm1549_vm4 = vweird.f32 %v1867_v36 }
 0x2ef   : > { %vm1550_vm6 = vmor %vm1548_vm5, %vm1549_vm4  ;;  %v1570_v52 = vor.u32 1.1754944e-38, %v1569_v62  ;;  %vm1568_vm11 = vcmp.eq.f32.partialorder %v1567_v10, 8.507059e+37 }
 0x2f0   : > { %v1545_v30 = vsub.f32 1.0, %v1544_v25 }
 0x2f2   : > { %v1546_v59 = vmul.f32 %v1867_v36, %v1545_v30 }
 0x2f3   : > { %v1869_v11 = vpop.eup %1868 }
 0x2f4   : > { %v1559_v23 = vmul.f32 %v1869_v11, %v1542_v50  ;;  %v1547_v1 = vadd.f32 %v1867_v36, %v1546_v59  ;;  %vm1564_vm8 = vweird.f32 %v1869_v11 }
 0x2f5   : > { %vm1565_vm10 = vmor %vm1563_vm9, %vm1564_vm8 }
 0x2f6   : > { %v1560_v14 = vsub.f32 1.0, %v1559_v23  ;;  %v1551_v55 = vsel %vm1550_vm6, %v1867_v36, %v1547_v1 }
 0x2f7   : > { %v1556_v63 = vsel %vm1553_vm7, %v1555_v44, %v1551_v55 }
 0x2f8   : > { %v1561_v34 = vmul.f32 %v1869_v11, %v1560_v14  ;;  %1573 = vst.msk [vmem:[%s177_s13] sm:$0xff] %vm186_vm0, %v1556_v63 }
 0x2fa   : > { %v1562_v22 = vadd.f32 %v1869_v11, %v1561_v34 }
 0x2fc   : > { %v1566_v0 = vsel %vm1565_vm10, %v1869_v11, %v1562_v22 }
 0x2fd   : > { %v1571_v2 = vsel %vm1568_vm11, %v1570_v52, %v1566_v0 }
 0x2fe   : > { %1574 = vst.msk [vmem:[%s177_s13 + $0x8] sm:$0xff] %vm186_vm0, %v1571_v2 }
 0x2ff   : > { %1942 = shalt.err (!%p1939_p8)
}
 0x300   : > { %s1998_s4 = smov 128   ;;  %s1999_s24 = smov 8  }
 0x301   : > { %1799 = dma.vmem_to_hbm [thread:$0]  (%p2067_p11), %s1589_s28, 256, %s1591_s14, %s1576_s16, %s1998_s4, %s1998_s4, %s1999_s24  }
 0x302 PF: > { %s1605_s25 = sand.u32 1, %s1973_s9   ;;  %p2902_p9 = scmp.ge.s32.totalorder %s1985_s12, 2 }
 0x303   : > { %s1606_s30 = scalar_lea.sflag [#allocation5], %s1605_s25 }
 0x304   : > { %p1810_p10 = pnand %p2902_p9, %p2071_p12 }
 0x306   : > { %p1811_p1 = pneg %p1810_p10 }
 0x308   : > { %1968 = dma.done.wait (%p1811_p1), %s1606_s30, 256  }
 0x309   : > { %1970 = vsyncadd (%p1811_p1), %s1606_s30, 4294967040  ;;  %p16_p2 = scmp.ge.s32.totalorder %s2040_s15, 4   ;;  %s2903_s9 = smov %s1977_s10 }
 0x30a   : > { %s2904_s10 = smov %s1981_s11  ;;  %s2905_s11 = smov %s2052_s18 }
 0x30b   : > { %s2906_s12 = smov %s2040_s15  ;;  %18 = sbr.rel (!%p16_p2) target bundleno = 6 (0x6), region = 79 }
 0x310   :  { %1612 = vsyncpa [#allocation4], 1 }
 0x311   :  { %1614 = vsyncpa [#allocation4 + $0x1], 1 }
 0x312   :  { %1615 = vsyncpa [#allocation5], 1 }
 0x313   :  { %1617 = vsyncpa [#allocation5 + $0x1], 1 }
 0x314   :  { %1618 = vsyncpa [#allocation6], 1 }
 0x315   :  { %1620 = vsyncpa [#allocation6 + $0x1], 1 }

</bundles_post_ra>
